<compile_context>
chip_gen: v7x
topology: tpu7x:2x2x1
jax: 0.10.0
libtpu: 0.0.40
codegen_flags: <defaults>
</compile_context>

<pallas_src>
import jax
import jax.numpy as jnp
from jax.experimental import pallas as pl
from jax.experimental.pallas import tpu as pltpu


def _round_up(a, m):
    return (a + m - 1) // m * m


def ssl_kernel(x_ref, we1_ref, be1_ref, we2_ref, be2_ref,
               wp1_ref, bp1_ref, wp2_ref, bp2_ref, z_ref, p_ref):
    # x_ref:   (TB, F)     row tile holding rows of both views
    # encoder: (F, H) + (1, H) ; (H, P) + (1, P)
    # predictor: (P, H) + (1, H) ; (H, P) + (1, P)
    # z_ref, p_ref: (TB, P)
    x = x_ref[...]

    # encoder: z = relu(x @ We1 + be1) @ We2 + be2
    h = jnp.dot(x, we1_ref[...], preferred_element_type=jnp.float32) + be1_ref[...]
    h = jnp.maximum(h, 0.0)
    z = jnp.dot(h, we2_ref[...], preferred_element_type=jnp.float32) + be2_ref[...]

    # predictor: p = relu(z @ Wp1 + bp1) @ Wp2 + bp2
    g = jnp.dot(z, wp1_ref[...], preferred_element_type=jnp.float32) + bp1_ref[...]
    g = jnp.maximum(g, 0.0)
    p = jnp.dot(g, wp2_ref[...], preferred_element_type=jnp.float32) + bp2_ref[...]

    z_ref[...] = z.astype(z_ref.dtype)
    p_ref[...] = p.astype(p_ref.dtype)


def self_supervised_contrastive_forward(x1, x2, params, *, row_tile=256):
    """x1, x2: (B, feature_dim) float32.  Returns (p1, p2, z1, z2)."""
    B, F = x1.shape
    P = params["we2"].shape[1]

    # Stack both views: one encoder pass + one predictor pass over 2B rows.
    x = jnp.concatenate([x1, x2], axis=0)            # (2B, F)
    rows = 2 * B
    TB = min(_round_up(rows, 8), row_tile)           # row tile (sublane-aligned)
    rows_p = _round_up(rows, TB)
    if rows_p != rows:
        x = jnp.pad(x, ((0, rows_p - rows), (0, 0)))

    names = ["we1", "be1", "we2", "be2", "wp1", "bp1", "wp2", "bp2"]
    weight_args = [params[n] for n in names]
    # Grid-invariant weights / biases: full blocks, constant index map.
    weight_specs = [pl.BlockSpec(a.shape, lambda i: (0, 0)) for a in weight_args]

    z_pad, p_pad = pl.pallas_call(
        ssl_kernel,
        out_shape=(jax.ShapeDtypeStruct((rows_p, P), x1.dtype),
                   jax.ShapeDtypeStruct((rows_p, P), x1.dtype)),
        grid=(rows_p // TB,),
        in_specs=[pl.BlockSpec((TB, F), lambda i: (i, 0))] + weight_specs,
        out_specs=(pl.BlockSpec((TB, P), lambda i: (i, 0)),
                   pl.BlockSpec((TB, P), lambda i: (i, 0))),
        compiler_params=pltpu.CompilerParams(
            dimension_semantics=("parallel",)),
    )(x, *weight_args)

    z = z_pad[:rows]
    p = p_pad[:rows]
    z1, z2 = z[:B], z[B:]
    p1, p2 = p[:B], p[B:]
    return p1, p2, z1, z2


def init_params(key, feature_dim, projection_dim, hidden=512):
    """Deterministic synthetic parameters. Weights stored (in, out)."""
    ks = jax.random.split(key, 8)

    def dense(kw, kb, fan_in, fan_out):
        s = float(fan_in) ** -0.5
        w = s * jax.random.normal(kw, (fan_in, fan_out), jnp.float32)
        b = s * jax.random.normal(kb, (1, fan_out), jnp.float32)
        return w, b

    we1, be1 = dense(ks[0], ks[1], feature_dim, hidden)
    we2, be2 = dense(ks[2], ks[3], hidden, projection_dim)
    wp1, bp1 = dense(ks[4], ks[5], projection_dim, hidden)
    wp2, bp2 = dense(ks[6], ks[7], hidden, projection_dim)
    return dict(we1=we1, be1=be1, we2=we2, be2=be2,
                wp1=wp1, bp1=bp1, wp2=wp2, bp2=bp2)


def reference_forward(x1, x2, params):
    """Pure-JAX reference of the PyTorch forward."""
    hi = jax.lax.Precision.HIGHEST

    def mlp(x, w1, b1, w2, b2):
        h = jnp.maximum(jnp.dot(x, w1, precision=hi) + b1, 0.0)
        return jnp.dot(h, w2, precision=hi) + b2

    def encoder(x):
        return mlp(x, params["we1"], params["be1"], params["we2"], params["be2"])

    def predictor(x):
        return mlp(x, params["wp1"], params["bp1"], params["wp2"], params["bp2"])

    z1, z2 = encoder(x1), encoder(x2)
    p1, p2 = predictor(z1), predictor(z2)
    return p1, p2, z1, z2


if __name__ == "__main__":
    key = jax.random.PRNGKey(0)
    k1, k2, kp = jax.random.split(key, 3)

    B, F, P = 8, 256, 128          # batch per view, feature_dim, projection_dim
    x1 = jax.random.normal(k1, (B, F), jnp.float32)
    x2 = jax.random.normal(k2, (B, F), jnp.float32)
    params = init_params(kp, F, P)

    out = jax.block_until_ready(self_supervised_contrastive_forward(x1, x2, params))
    ref = jax.block_until_ready(reference_forward(x1, x2, params))

    assert len(out) == 4
    for o, r in zip(out, ref):
        assert o.shape == r.shape
        assert jnp.allclose(o, r, atol=2e-2, rtol=2e-2), float(jnp.max(jnp.abs(o - r)))

    print("KERNEL_OK")
</pallas_src>

<mosaic_0001>
module attributes {stable_mosaic.version = 11 : i64} {
  func.func @ssl_kernel(%arg0: i32, %arg1: memref<16x256xf32, #tpu.memory_space<vmem>>, %arg2: memref<256x512xf32, #tpu.memory_space<vmem>>, %arg3: memref<1x512xf32, #tpu.memory_space<vmem>>, %arg4: memref<512x128xf32, #tpu.memory_space<vmem>>, %arg5: memref<1x128xf32, #tpu.memory_space<vmem>>, %arg6: memref<128x512xf32, #tpu.memory_space<vmem>>, %arg7: memref<1x512xf32, #tpu.memory_space<vmem>>, %arg8: memref<512x128xf32, #tpu.memory_space<vmem>>, %arg9: memref<1x128xf32, #tpu.memory_space<vmem>>, %arg10: memref<16x128xf32, #tpu.memory_space<vmem>>, %arg11: memref<16x128xf32, #tpu.memory_space<vmem>>) attributes {dimension_semantics = [#tpu.dimension_semantics<parallel>], iteration_bounds = array<i64: 1>, scalar_prefetch = 0 : i64, scratch_operands = 0 : i64, tpu.core_type = #tpu.core_type<tc>, window_params = [{transform_indices = @transform_0, window_bounds = array<i64: 16, 256>}, {pipeline_mode = #tpu.pipeline_mode<synchronous>, transform_indices = @transform_1, window_bounds = array<i64: 256, 512>}, {pipeline_mode = #tpu.pipeline_mode<synchronous>, transform_indices = @transform_2, window_bounds = array<i64: 1, 512>}, {pipeline_mode = #tpu.pipeline_mode<synchronous>, transform_indices = @transform_3, window_bounds = array<i64: 512, 128>}, {pipeline_mode = #tpu.pipeline_mode<synchronous>, transform_indices = @transform_4, window_bounds = array<i64: 1, 128>}, {pipeline_mode = #tpu.pipeline_mode<synchronous>, transform_indices = @transform_5, window_bounds = array<i64: 128, 512>}, {pipeline_mode = #tpu.pipeline_mode<synchronous>, transform_indices = @transform_6, window_bounds = array<i64: 1, 512>}, {pipeline_mode = #tpu.pipeline_mode<synchronous>, transform_indices = @transform_7, window_bounds = array<i64: 512, 128>}, {pipeline_mode = #tpu.pipeline_mode<synchronous>, transform_indices = @transform_8, window_bounds = array<i64: 1, 128>}, {transform_indices = @transform_9, window_bounds = array<i64: 16, 128>}, {transform_indices = @transform_10, window_bounds = array<i64: 16, 128>}]} {
    %c0 = arith.constant 0 : index
    %c0_0 = arith.constant 0 : index
    %0 = vector.load %arg1[%c0, %c0_0] : memref<16x256xf32, #tpu.memory_space<vmem>>, vector<16x256xf32>
    %c0_1 = arith.constant 0 : index
    %c0_2 = arith.constant 0 : index
    %1 = vector.load %arg2[%c0_1, %c0_2] : memref<256x512xf32, #tpu.memory_space<vmem>>, vector<256x512xf32>
    %cst = arith.constant dense<0.000000e+00> : vector<16x512xf32>
    %2 = tpu.matmul %0, %1, %cst {dimension_numbers = #tpu.dot_dimension_numbers<[1], [0], [0], [1], [0, 0, 1, 1], [], []>} : vector<16x256xf32>, vector<256x512xf32>, vector<16x512xf32> -> vector<16x512xf32>
    %c0_3 = arith.constant 0 : index
    %c0_4 = arith.constant 0 : index
    %3 = vector.load %arg3[%c0_3, %c0_4] : memref<1x512xf32, #tpu.memory_space<vmem>>, vector<1x512xf32>
    %4 = vector.broadcast %3 : vector<1x512xf32> to vector<16x512xf32>
    %5 = arith.addf %2, %4 : vector<16x512xf32>
    %cst_5 = arith.constant 0.000000e+00 : f32
    %6 = vector.broadcast %cst_5 : f32 to vector<16x512xf32>
    %7 = arith.maximumf %5, %6 : vector<16x512xf32>
    %c0_6 = arith.constant 0 : index
    %c0_7 = arith.constant 0 : index
    %8 = vector.load %arg4[%c0_6, %c0_7] : memref<512x128xf32, #tpu.memory_space<vmem>>, vector<512x128xf32>
    %cst_8 = arith.constant dense<0.000000e+00> : vector<16x128xf32>
    %9 = tpu.matmul %7, %8, %cst_8 {dimension_numbers = #tpu.dot_dimension_numbers<[1], [0], [0], [1], [0, 0, 1, 1], [], []>} : vector<16x512xf32>, vector<512x128xf32>, vector<16x128xf32> -> vector<16x128xf32>
    %c0_9 = arith.constant 0 : index
    %c0_10 = arith.constant 0 : index
    %10 = vector.load %arg5[%c0_9, %c0_10] : memref<1x128xf32, #tpu.memory_space<vmem>>, vector<1x128xf32>
    %11 = vector.broadcast %10 : vector<1x128xf32> to vector<16x128xf32>
    %12 = arith.addf %9, %11 : vector<16x128xf32>
    %c0_11 = arith.constant 0 : index
    %c0_12 = arith.constant 0 : index
    %13 = vector.load %arg6[%c0_11, %c0_12] : memref<128x512xf32, #tpu.memory_space<vmem>>, vector<128x512xf32>
    %cst_13 = arith.constant dense<0.000000e+00> : vector<16x512xf32>
    %14 = tpu.matmul %12, %13, %cst_13 {dimension_numbers = #tpu.dot_dimension_numbers<[1], [0], [0], [1], [0, 0, 1, 1], [], []>} : vector<16x128xf32>, vector<128x512xf32>, vector<16x512xf32> -> vector<16x512xf32>
    %c0_14 = arith.constant 0 : index
    %c0_15 = arith.constant 0 : index
    %15 = vector.load %arg7[%c0_14, %c0_15] : memref<1x512xf32, #tpu.memory_space<vmem>>, vector<1x512xf32>
    %16 = vector.broadcast %15 : vector<1x512xf32> to vector<16x512xf32>
    %17 = arith.addf %14, %16 : vector<16x512xf32>
    %cst_16 = arith.constant 0.000000e+00 : f32
    %18 = vector.broadcast %cst_16 : f32 to vector<16x512xf32>
    %19 = arith.maximumf %17, %18 : vector<16x512xf32>
    %c0_17 = arith.constant 0 : index
    %c0_18 = arith.constant 0 : index
    %20 = vector.load %arg8[%c0_17, %c0_18] : memref<512x128xf32, #tpu.memory_space<vmem>>, vector<512x128xf32>
    %cst_19 = arith.constant dense<0.000000e+00> : vector<16x128xf32>
    %21 = tpu.matmul %19, %20, %cst_19 {dimension_numbers = #tpu.dot_dimension_numbers<[1], [0], [0], [1], [0, 0, 1, 1], [], []>} : vector<16x512xf32>, vector<512x128xf32>, vector<16x128xf32> -> vector<16x128xf32>
    %c0_20 = arith.constant 0 : index
    %c0_21 = arith.constant 0 : index
    %22 = vector.load %arg9[%c0_20, %c0_21] : memref<1x128xf32, #tpu.memory_space<vmem>>, vector<1x128xf32>
    %23 = vector.broadcast %22 : vector<1x128xf32> to vector<16x128xf32>
    %24 = arith.addf %21, %23 : vector<16x128xf32>
    %c0_22 = arith.constant 0 : index
    %c0_23 = arith.constant 0 : index
    %25 = vector.load %arg10[%c0_22, %c0_23] : memref<16x128xf32, #tpu.memory_space<vmem>>, vector<16x128xf32>
    tpu.vector_store %arg10[%c0_22, %c0_23], %12 {strides = array<i32>} : memref<16x128xf32, #tpu.memory_space<vmem>>, vector<16x128xf32>,
    %c0_24 = arith.constant 0 : index
    %c0_25 = arith.constant 0 : index
    %26 = vector.load %arg11[%c0_24, %c0_25] : memref<16x128xf32, #tpu.memory_space<vmem>>, vector<16x128xf32>
    tpu.vector_store %arg11[%c0_24, %c0_25], %24 {strides = array<i32>} : memref<16x128xf32, #tpu.memory_space<vmem>>, vector<16x128xf32>,
    return
  }
  func.func @transform_0(%arg0: i32) -> (i32, i32) {
    %c0_i32 = arith.constant 0 : i32
    %c0_i32_0 = arith.constant 0 : i32
    return %arg0, %c0_i32 : i32, i32
  }
  func.func @transform_1(%arg0: i32) -> (i32, i32) {
    %c0_i32 = arith.constant 0 : i32
    %c0_i32_0 = arith.constant 0 : i32
    %c0_i32_1 = arith.constant 0 : i32
    return %c0_i32, %c0_i32_0 : i32, i32
  }
  func.func @transform_2(%arg0: i32) -> (i32, i32) {
    %c0_i32 = arith.constant 0 : i32
    %c0_i32_0 = arith.constant 0 : i32
    %c0_i32_1 = arith.constant 0 : i32
    return %c0_i32, %c0_i32_0 : i32, i32
  }
  func.func @transform_3(%arg0: i32) -> (i32, i32) {
    %c0_i32 = arith.constant 0 : i32
    %c0_i32_0 = arith.constant 0 : i32
    %c0_i32_1 = arith.constant 0 : i32
    return %c0_i32, %c0_i32_0 : i32, i32
  }
  func.func @transform_4(%arg0: i32) -> (i32, i32) {
    %c0_i32 = arith.constant 0 : i32
    %c0_i32_0 = arith.constant 0 : i32
    %c0_i32_1 = arith.constant 0 : i32
    return %c0_i32, %c0_i32_0 : i32, i32
  }
  func.func @transform_5(%arg0: i32) -> (i32, i32) {
    %c0_i32 = arith.constant 0 : i32
    %c0_i32_0 = arith.constant 0 : i32
    %c0_i32_1 = arith.constant 0 : i32
    return %c0_i32, %c0_i32_0 : i32, i32
  }
  func.func @transform_6(%arg0: i32) -> (i32, i32) {
    %c0_i32 = arith.constant 0 : i32
    %c0_i32_0 = arith.constant 0 : i32
    %c0_i32_1 = arith.constant 0 : i32
    return %c0_i32, %c0_i32_0 : i32, i32
  }
  func.func @transform_7(%arg0: i32) -> (i32, i32) {
    %c0_i32 = arith.constant 0 : i32
    %c0_i32_0 = arith.constant 0 : i32
    %c0_i32_1 = arith.constant 0 : i32
    return %c0_i32, %c0_i32_0 : i32, i32
  }
  func.func @transform_8(%arg0: i32) -> (i32, i32) {
    %c0_i32 = arith.constant 0 : i32
    %c0_i32_0 = arith.constant 0 : i32
    %c0_i32_1 = arith.constant 0 : i32
    return %c0_i32, %c0_i32_0 : i32, i32
  }
  func.func @transform_9(%arg0: i32) -> (i32, i32) {
    %c0_i32 = arith.constant 0 : i32
    %c0_i32_0 = arith.constant 0 : i32
    return %arg0, %c0_i32 : i32, i32
  }
  func.func @transform_10(%arg0: i32) -> (i32, i32) {
    %c0_i32 = arith.constant 0 : i32
    %c0_i32_0 = arith.constant 0 : i32
    return %arg0, %c0_i32 : i32, i32
  }
}

</mosaic_0001>

<bundles_post_ra>
// kernel: tpu_custom_call.1
= control target key start
LH: loop header
LB: loop body
LE: loop exit
PB: predicated region body
PF: predicated region fallthrough
CT: control target
= control target key end

     0   :  { %16 = vsyncpa [#allocation3], 0  ;;  %s2000_s0 = inlined_call_operand.hbm [shape: f32[16,256], index: 0, kind: input, shape index: {}]   ;;  %s2001_s1 = inlined_call_operand.hbm [shape: f32[256,512], index: 1, kind: input, shape index: {}]   ;;  %s2002_s2 = inlined_call_operand.vmem [shape: f32[1,512], index: 2, kind: input, shape index: {}]   ;;  %s2003_s3 = inlined_call_operand.hbm [shape: f32[512,128], index: 3, kind: input, shape index: {}]   ;;  %s2004_s4 = inlined_call_operand.vmem [shape: f32[1,128], index: 4, kind: input, shape index: {}]   ;;  %s2005_s5 = inlined_call_operand.hbm [shape: f32[128,512], index: 5, kind: input, shape index: {}]   ;;  %s2006_s6 = inlined_call_operand.vmem [shape: f32[1,512], index: 6, kind: input, shape index: {}]   ;;  %s2007_s7 = inlined_call_operand.hbm [shape: f32[512,128], index: 7, kind: input, shape index: {}]   ;;  %s2008_s8 = inlined_call_operand.vmem [shape: f32[1,128], index: 8, kind: input, shape index: {}]   ;;  %s2009_s9 = inlined_call_operand.hbm [shape: f32[16,128], index: 9, kind: output, shape index: {0}]   ;;  %s2010_s10 = inlined_call_operand.hbm [shape: f32[16,128], index: 10, kind: output, shape index: {1}]  }
   0x1   :  { %17 = vsyncpa [#allocation6], 0 }
   0x2   :  { %18 = vsyncpa [#allocation9], 0 }
   0x3   :  { %19 = vsyncpa [#allocation4], 0 }
   0x4   :  { %20 = vsyncpa [#allocation13], 0  ;;  %s1801_s13 = smov [#allocation5]   ;;  %s1637_s17 = scalar_lea.hbm %s2001_s1, 16384 }
   0x5   :  { %s38_s14 = sshll.u32 %s1801_s13, 4  ;;  %p1638_p0 = scmp.ne.s32.totalorder %s2001_s1, %s1637_s17  ;;  %s39_s14 = int_to_ptr.vmem [resolvable:$true] %s38_s14 }
   0x6   :  { %p1641_p1 = scmp.lt.u32.totalorder %s1637_s17, %s2001_s1 }
   0x8   :  { %p1643_p2 = pnand %p1641_p1, %p1638_p0 }
   0xa   :  { %1646 = shalt.err (!%p1643_p2)
}
   0xb   :  { %s1647_s22 = scalar_lea.vmem %s39_s14, 16384  ;;  %p1652_p4 = scmp.lt.s32.totalorder %s39_s14, %s39_s14 }
   0xc   :  { %p1648_p3 = scmp.ne.s32.totalorder %s39_s14, %s1647_s22  ;;  %p1653_p5 = scmp.lt.s32.totalorder %s1647_s22, %s1647_s22 }
   0xe   :  { %p1654_p6 = por %p1653_p5, %p1652_p4 }
  0x10   :  { %p1655_p7 = pnand %p1654_p6, %p1648_p3 }
  0x12   :  { %1658 = shalt.err (!%p1655_p7)
}
  0x13   :  { %s1802_s23 = smov 512   ;;  %s1803_s24 = smov 32  }
  0x14   :  { %44 = dma.hbm_to_vmem [thread:$0]  %s2001_s1, 16384, %s39_s14, [#allocation6], %s1802_s23, %s1802_s23, %s1803_s24  }
  0x15   :  { %s1804_s27 = smov [#allocation8]   ;;  %s1805_s29 = smov [#allocation2]  }
  0x16   :  { %s66_s28 = sshll.u32 %s1804_s27, 4  ;;  %s26_s30 = sshll.u32 %s1805_s29, 4  ;;  %s67_s28 = int_to_ptr.vmem [resolvable:$true] %s66_s28  ;;  %s27_s30 = int_to_ptr.vmem [resolvable:$true] %s26_s30 }
  0x17   :  { %s1659_s13 = scalar_lea.hbm %s2005_s5, 8192 }
  0x18   :  { %p1660_p8 = scmp.ne.s32.totalorder %s2005_s5, %s1659_s13  ;;  %p1663_p9 = scmp.lt.u32.totalorder %s1659_s13, %s2005_s5 }
  0x1a   :  { %p1665_p10 = pnand %p1663_p9, %p1660_p8 }
  0x1c   :  { %1668 = shalt.err (!%p1665_p10)
}
  0x1d   :  { %s1669_s1 = scalar_lea.vmem %s67_s28, 8192  ;;  %p1674_p12 = scmp.lt.s32.totalorder %s67_s28, %s67_s28 }
  0x1e   :  { %p1670_p11 = scmp.ne.s32.totalorder %s67_s28, %s1669_s1  ;;  %p1675_p13 = scmp.lt.s32.totalorder %s1669_s1, %s1669_s1 }
  0x20   :  { %p1676_p0 = por %p1675_p13, %p1674_p12 }
  0x22   :  { %p1677_p1 = pnand %p1676_p0, %p1670_p11 }
  0x24   :  { %1680 = shalt.err (!%p1677_p1)
}
  0x25   :  { %72 = dma.hbm_to_vmem [thread:$0]  %s2005_s5, 8192, %s67_s28, [#allocation9], %s1802_s23, %s1802_s23, %s1803_s24  }
  0x26   :  { %s1681_s22 = scalar_lea.hbm %s2000_s0, 512 }
  0x27   :  { %p1682_p2 = scmp.ne.s32.totalorder %s2000_s0, %s1681_s22  ;;  %p1685_p3 = scmp.lt.u32.totalorder %s1681_s22, %s2000_s0 }
  0x29   :  { %p1687_p4 = pnand %p1685_p3, %p1682_p2 }
  0x2b   :  { %1690 = shalt.err (!%p1687_p4)
}
  0x2c   :  { %s1691_s11 = scalar_lea.vmem %s27_s30, 512  ;;  %p1696_p6 = scmp.lt.s32.totalorder %s27_s30, %s27_s30 }
  0x2d   :  { %p1692_p5 = scmp.ne.s32.totalorder %s27_s30, %s1691_s11  ;;  %p1697_p7 = scmp.lt.s32.totalorder %s1691_s11, %s1691_s11 }
  0x2f   :  { %p1698_p8 = por %p1697_p7, %p1696_p6 }
  0x31   :  { %p1699_p9 = pnand %p1698_p8, %p1692_p5 }
  0x33   :  { %1702 = shalt.err (!%p1699_p9)
}
  0x34   :  { %s1806_s5 = smov 256   ;;  %s1807_s23 = smov 16  }
  0x35   :  { %32 = dma.hbm_to_vmem [thread:$0]  %s2000_s0, 512, %s27_s30, [#allocation3], %s1806_s5, %s1806_s5, %s1807_s23  }
  0x36   :  { %s1808_s12 = smov [#allocation7]   ;;  %s1703_s17 = scalar_lea.hbm %s2003_s3, 8192 }
  0x37   :  { %s52_s13 = sshll.u32 %s1808_s12, 4  ;;  %p1704_p10 = scmp.ne.s32.totalorder %s2003_s3, %s1703_s17  ;;  %s53_s13 = int_to_ptr.vmem [resolvable:$true] %s52_s13 }
  0x38   :  { %p1707_p11 = scmp.lt.u32.totalorder %s1703_s17, %s2003_s3 }
  0x3a   :  { %p1709_p12 = pnand %p1707_p11, %p1704_p10 }
  0x3c   :  { %1712 = shalt.err (!%p1709_p12)
}
  0x3d   :  { %s1713_s20 = scalar_lea.vmem %s53_s13, 8192  ;;  %p1718_p0 = scmp.lt.s32.totalorder %s53_s13, %s53_s13 }
  0x3e   :  { %p1714_p13 = scmp.ne.s32.totalorder %s53_s13, %s1713_s20  ;;  %p1719_p1 = scmp.lt.s32.totalorder %s1713_s20, %s1713_s20 }
  0x40   :  { %p1720_p2 = por %p1719_p1, %p1718_p0 }
  0x42   :  { %p1721_p3 = pnand %p1720_p2, %p1714_p13 }
  0x44   :  { %1724 = shalt.err (!%p1721_p3)
}
  0x45   :  { %s1809_s0 = smov 128   ;;  %s1810_s30 = smov 8  }
  0x46   :  { %58 = dma.hbm_to_vmem [thread:$0]  %s2003_s3, 8192, %s53_s13, [#allocation6], %s1809_s0, %s1809_s0, %s1810_s30  }
  0x47   :  { %s1811_s25 = smov [#allocation10]   ;;  %s1725_s11 = scalar_lea.hbm %s2007_s7, 8192 }
  0x48   :  { %s80_s26 = sshll.u32 %s1811_s25, 4  ;;  %p1726_p4 = scmp.ne.s32.totalorder %s2007_s7, %s1725_s11  ;;  %s81_s26 = int_to_ptr.vmem [resolvable:$true] %s80_s26 }
  0x49   :  { %p1729_p5 = scmp.lt.u32.totalorder %s1725_s11, %s2007_s7 }
  0x4b   :  { %p1731_p6 = pnand %p1729_p5, %p1726_p4 }
  0x4d   :  { %1734 = shalt.err (!%p1731_p6)
}
  0x4e   :  { %s1735_s12 = scalar_lea.vmem %s81_s26, 8192  ;;  %p1740_p8 = scmp.lt.s32.totalorder %s81_s26, %s81_s26 }
  0x4f   :  { %p1736_p7 = scmp.ne.s32.totalorder %s81_s26, %s1735_s12  ;;  %p1741_p9 = scmp.lt.s32.totalorder %s1735_s12, %s1735_s12 }
  0x51   :  { %p1742_p10 = por %p1741_p9, %p1740_p8 }
  0x53   :  { %p1743_p11 = pnand %p1742_p10, %p1736_p7 }
  0x55   :  { %1746 = shalt.err (!%p1743_p11)
}
  0x56   :  { %86 = dma.hbm_to_vmem [thread:$0]  %s2007_s7, 8192, %s81_s26, [#allocation9], %s1809_s0, %s1809_s0, %s1810_s30  }
  0x57   :  { %1791 = dma.done.wait [#allocation3], 512  }
  0x58   :  { %1792 = vsyncadd [#allocation3], 4294966784 }
  0x59   :  { %1793 = dma.done.wait [#allocation6], 24576  }
  0x5a   :  { %1794 = vsyncadd [#allocation6], 4294942720 }
  0x5b   :  { %1795 = dma.done.wait [#allocation9], 16384  }
  0x5c   :  { %1796 = vsyncadd [#allocation9], 4294950912  ;;  %v109_v0 = vld [vmem:[#allocation5 + $0x8] sm:$0xff]  ;;  %v111_v2 = vld [vmem:[#allocation5 + $0x18] sm:$0xff] }
  0x5d   :  { %v113_v1 = vld [vmem:[#allocation5 + $0x28] sm:$0xff]  ;;  %v115_v4 = vld [vmem:[#allocation5 + $0x38] sm:$0xff]  ;;  %v108_v5 = vld [vmem:[#allocation5] sm:$0xff] }
  0x5e   :  { %v1303_v3 = vpack.c.bf16 %v113_v1, %v109_v0  ;;  %v112_v6 = vld [vmem:[#allocation5 + $0x20] sm:$0xff]  ;;  %v1367_v7 = vpack.c.bf16 %v115_v4, %v111_v2  ;;  %v110_v9 = vld [vmem:[#allocation5 + $0x10] sm:$0xff]  ;;  %v117_v11 = vld [vmem:[#allocation5 + $0x48] sm:$0xff] }
  0x5f   :  { %v1305_v8 = vpack.c.bf16 %v112_v6, %v108_v5  ;;  %v114_v10 = vld [vmem:[#allocation5 + $0x30] sm:$0xff]  ;;  %v121_v13 = vld [vmem:[#allocation5 + $0x68] sm:$0xff]  ;;  %v119_v14 = vld [vmem:[#allocation5 + $0x58] sm:$0xff] }
  0x60   :  { %1304 = vmatprep.subr.bf16.mxu0 %v1303_v3  ;;  %v1369_v12 = vpack.c.bf16 %v114_v10, %v110_v9  ;;  %v123_v15 = vld [vmem:[#allocation5 + $0x78] sm:$0xff]  ;;  %1368 = vmatprep.subr.bf16.mxu1 %v1367_v7  ;;  %v1307_v16 = vpack.c.bf16 %v121_v13, %v117_v11  ;;  %v116_v18 = vld [vmem:[#allocation5 + $0x40] sm:$0xff]  ;;  %v118_v20 = vld [vmem:[#allocation5 + $0x50] sm:$0xff] }
  0x61   :  { %1306 = vmatpush1.bf16.msra.mxu0 %v1305_v8  ;;  %v1371_v17 = vpack.c.bf16 %v123_v15, %v119_v14  ;;  %v120_v19 = vld [vmem:[#allocation5 + $0x60] sm:$0xff]  ;;  %v122_v22 = vld [vmem:[#allocation5 + $0x70] sm:$0xff]  ;;  %v125_v23 = vld [vmem:[#allocation5 + $0x88] sm:$0xff] }
  0x62   :  { %1370 = vmatpush1.bf16.msra.mxu1 %v1369_v12  ;;  %v1309_v21 = vpack.c.bf16 %v120_v19, %v116_v18  ;;  %v129_v24 = vld [vmem:[#allocation5 + $0xa8] sm:$0xff]  ;;  %1308 = vmatprep.subr.bf16.mxu0 %v1307_v16  ;;  %v1373_v25 = vpack.c.bf16 %v122_v22, %v118_v20  ;;  %v127_v27 = vld [vmem:[#allocation5 + $0x98] sm:$0xff]  ;;  %v124_v29 = vld [vmem:[#allocation5 + $0x80] sm:$0xff] }
  0x63   :  { %1372 = vmatprep.subr.bf16.mxu1 %v1371_v17  ;;  %v1311_v26 = vpack.c.bf16 %v129_v24, %v125_v23  ;;  %v131_v28 = vld [vmem:[#allocation5 + $0xb8] sm:$0xff]  ;;  %v128_v31 = vld [vmem:[#allocation5 + $0xa0] sm:$0xff]  ;;  %v126_v32 = vld [vmem:[#allocation5 + $0x90] sm:$0xff] }
  0x64   :  { %v1375_v30 = vpack.c.bf16 %v131_v28, %v127_v27  ;;  %v130_v33 = vld [vmem:[#allocation5 + $0xb0] sm:$0xff]  ;;  %v1313_v34 = vpack.c.bf16 %v128_v31, %v124_v29  ;;  %v133_v35 = vld [vmem:[#allocation5 + $0xc8] sm:$0xff]  ;;  %v135_v37 = vld [vmem:[#allocation5 + $0xd8] sm:$0xff] }
  0x65   :  { %1310 = vmatpush1.bf16.msra.mxu0 %v1309_v21  ;;  %v137_v36 = vld [vmem:[#allocation5 + $0xe8] sm:$0xff]  ;;  %v1377_v38 = vpack.c.bf16 %v130_v33, %v126_v32  ;;  %v139_v40 = vld [vmem:[#allocation5 + $0xf8] sm:$0xff]  ;;  %v132_v41 = vld [vmem:[#allocation5 + $0xc0] sm:$0xff] }
  0x66   :  { %1374 = vmatpush1.bf16.msra.mxu1 %v1373_v25  ;;  %1312 = vmatprep.subr.bf16.mxu0 %v1311_v26  ;;  %v1315_v39 = vpack.c.bf16 %v137_v36, %v133_v35  ;;  %v136_v42 = vld [vmem:[#allocation5 + $0xe0] sm:$0xff]  ;;  %v1379_v43 = vpack.c.bf16 %v139_v40, %v135_v37  ;;  %v134_v44 = vld [vmem:[#allocation5 + $0xd0] sm:$0xff]  ;;  %v141_v46 = vld [vmem:[#allocation5 + $0x108] sm:$0xff] }
  0x67   :  { %1376 = vmatprep.subr.bf16.mxu1 %v1375_v30  ;;  %v138_v45 = vld [vmem:[#allocation5 + $0xf0] sm:$0xff]  ;;  %v145_v47 = vld [vmem:[#allocation5 + $0x128] sm:$0xff]  ;;  %v143_v48 = vld [vmem:[#allocation5 + $0x118] sm:$0xff]  ;;  %v1317_v50 = vpack.c.bf16 %v136_v42, %v132_v41 }
  0x68   :  { %v147_v49 = vld [vmem:[#allocation5 + $0x138] sm:$0xff]  ;;  %v1381_v51 = vpack.c.bf16 %v138_v45, %v134_v44  ;;  %v1319_v52 = vpack.c.bf16 %v145_v47, %v141_v46  ;;  %v140_v53 = vld [vmem:[#allocation5 + $0x100] sm:$0xff]  ;;  %v142_v55 = vld [vmem:[#allocation5 + $0x110] sm:$0xff] }
  0x69   :  { %1314 = vmatpush1.bf16.msra.mxu0 %v1313_v34  ;;  %v144_v54 = vld [vmem:[#allocation5 + $0x120] sm:$0xff]  ;;  %v1383_v56 = vpack.c.bf16 %v147_v49, %v143_v48  ;;  %v146_v57 = vld [vmem:[#allocation5 + $0x130] sm:$0xff]  ;;  %v149_v58 = vld [vmem:[#allocation5 + $0x148] sm:$0xff] }
  0x6a   :  { %1378 = vmatpush1.bf16.msra.mxu1 %v1377_v38  ;;  %1316 = vmatprep.subr.bf16.mxu0 %v1315_v39  ;;  %v153_v59 = vld [vmem:[#allocation5 + $0x168] sm:$0xff]  ;;  %v151_v60 = vld [vmem:[#allocation5 + $0x158] sm:$0xff]  ;;  %v1321_v62 = vpack.c.bf16 %v144_v54, %v140_v53  ;;  %v1385_v63 = vpack.c.bf16 %v146_v57, %v142_v55  ;;  %v148_v1 = vld [vmem:[#allocation5 + $0x140] sm:$0xff] }
  0x6b   :  { %1380 = vmatprep.subr.bf16.mxu1 %v1379_v43  ;;  %v155_v61 = vld [vmem:[#allocation5 + $0x178] sm:$0xff]  ;;  %v1323_v0 = vpack.c.bf16 %v153_v59, %v149_v58  ;;  %v152_v2 = vld [vmem:[#allocation5 + $0x160] sm:$0xff]  ;;  %v150_v3 = vld [vmem:[#allocation5 + $0x150] sm:$0xff] }
  0x6c   :  { %v1387_v4 = vpack.c.bf16 %v155_v61, %v151_v60  ;;  %v154_v5 = vld [vmem:[#allocation5 + $0x170] sm:$0xff]  ;;  %v157_v6 = vld [vmem:[#allocation5 + $0x188] sm:$0xff]  ;;  %v159_v8 = vld [vmem:[#allocation5 + $0x198] sm:$0xff]  ;;  %v1325_v10 = vpack.c.bf16 %v152_v2, %v148_v1 }
  0x6d   :  { %1318 = vmatpush1.bf16.msra.mxu0 %v1317_v50  ;;  %v161_v7 = vld [vmem:[#allocation5 + $0x1a8] sm:$0xff]  ;;  %v163_v9 = vld [vmem:[#allocation5 + $0x1b8] sm:$0xff]  ;;  %v1389_v11 = vpack.c.bf16 %v154_v5, %v150_v3  ;;  %v156_v13 = vld [vmem:[#allocation5 + $0x180] sm:$0xff] }
  0x6e   :  { %1382 = vmatpush1.bf16.msra.mxu1 %v1381_v51  ;;  %1320 = vmatprep.subr.bf16.mxu0 %v1319_v52  ;;  %v1327_v12 = vpack.c.bf16 %v161_v7, %v157_v6  ;;  %v160_v14 = vld [vmem:[#allocation5 + $0x1a0] sm:$0xff]  ;;  %v158_v15 = vld [vmem:[#allocation5 + $0x190] sm:$0xff]  ;;  %v1391_v16 = vpack.c.bf16 %v163_v9, %v159_v8  ;;  %v165_v18 = vld [vmem:[#allocation5 + $0x1c8] sm:$0xff] }
  0x6f   :  { %1384 = vmatprep.subr.bf16.mxu1 %v1383_v56  ;;  %v162_v17 = vld [vmem:[#allocation5 + $0x1b0] sm:$0xff]  ;;  %v169_v19 = vld [vmem:[#allocation5 + $0x1e8] sm:$0xff]  ;;  %v167_v20 = vld [vmem:[#allocation5 + $0x1d8] sm:$0xff]  ;;  %v1329_v22 = vpack.c.bf16 %v160_v14, %v156_v13 }
  0x70   :  { %v171_v21 = vld [vmem:[#allocation5 + $0x1f8] sm:$0xff]  ;;  %v1393_v23 = vpack.c.bf16 %v162_v17, %v158_v15  ;;  %v1331_v24 = vpack.c.bf16 %v169_v19, %v165_v18  ;;  %v164_v25 = vld [vmem:[#allocation5 + $0x1c0] sm:$0xff]  ;;  %v166_v27 = vld [vmem:[#allocation5 + $0x1d0] sm:$0xff] }
  0x71   :  { %1322 = vmatpush1.bf16.msra.mxu0 %v1321_v62  ;;  %v168_v26 = vld [vmem:[#allocation5 + $0x1e0] sm:$0xff]  ;;  %v1395_v28 = vpack.c.bf16 %v171_v21, %v167_v20  ;;  %v170_v29 = vld [vmem:[#allocation5 + $0x1f0] sm:$0xff]  ;;  %v173_v30 = vld [vmem:[#allocation5 + $0x208] sm:$0xff] }
  0x72   :  { %1386 = vmatpush1.bf16.msra.mxu1 %v1385_v63  ;;  %1324 = vmatprep.subr.bf16.mxu0 %v1323_v0  ;;  %v177_v31 = vld [vmem:[#allocation5 + $0x228] sm:$0xff]  ;;  %v175_v32 = vld [vmem:[#allocation5 + $0x218] sm:$0xff]  ;;  %v1333_v34 = vpack.c.bf16 %v168_v26, %v164_v25  ;;  %v1397_v35 = vpack.c.bf16 %v170_v29, %v166_v27  ;;  %v172_v37 = vld [vmem:[#allocation5 + $0x200] sm:$0xff] }
  0x73   :  { %1388 = vmatprep.subr.bf16.mxu1 %v1387_v4  ;;  %v179_v33 = vld [vmem:[#allocation5 + $0x238] sm:$0xff]  ;;  %v1335_v36 = vpack.c.bf16 %v177_v31, %v173_v30  ;;  %v176_v38 = vld [vmem:[#allocation5 + $0x220] sm:$0xff]  ;;  %v174_v39 = vld [vmem:[#allocation5 + $0x210] sm:$0xff] }
  0x74   :  { %v1399_v40 = vpack.c.bf16 %v179_v33, %v175_v32  ;;  %v178_v41 = vld [vmem:[#allocation5 + $0x230] sm:$0xff]  ;;  %v181_v42 = vld [vmem:[#allocation5 + $0x248] sm:$0xff]  ;;  %v183_v44 = vld [vmem:[#allocation5 + $0x258] sm:$0xff]  ;;  %v1337_v46 = vpack.c.bf16 %v176_v38, %v172_v37 }
  0x75   :  { %1326 = vmatpush1.bf16.msra.mxu0 %v1325_v10  ;;  %v185_v43 = vld [vmem:[#allocation5 + $0x268] sm:$0xff]  ;;  %v187_v45 = vld [vmem:[#allocation5 + $0x278] sm:$0xff]  ;;  %v1401_v47 = vpack.c.bf16 %v178_v41, %v174_v39  ;;  %v180_v49 = vld [vmem:[#allocation5 + $0x240] sm:$0xff] }
  0x76   :  { %1390 = vmatpush1.bf16.msra.mxu1 %v1389_v11  ;;  %1328 = vmatprep.subr.bf16.mxu0 %v1327_v12  ;;  %v1339_v48 = vpack.c.bf16 %v185_v43, %v181_v42  ;;  %v184_v50 = vld [vmem:[#allocation5 + $0x260] sm:$0xff]  ;;  %v182_v51 = vld [vmem:[#allocation5 + $0x250] sm:$0xff]  ;;  %v1403_v52 = vpack.c.bf16 %v187_v45, %v183_v44  ;;  %v189_v54 = vld [vmem:[#allocation5 + $0x288] sm:$0xff] }
  0x77   :  { %1392 = vmatprep.subr.bf16.mxu1 %v1391_v16  ;;  %v186_v53 = vld [vmem:[#allocation5 + $0x270] sm:$0xff]  ;;  %v193_v55 = vld [vmem:[#allocation5 + $0x2a8] sm:$0xff]  ;;  %v191_v56 = vld [vmem:[#allocation5 + $0x298] sm:$0xff]  ;;  %v1341_v58 = vpack.c.bf16 %v184_v50, %v180_v49 }
  0x78   :  { %v195_v57 = vld [vmem:[#allocation5 + $0x2b8] sm:$0xff]  ;;  %v1405_v59 = vpack.c.bf16 %v186_v53, %v182_v51  ;;  %v1343_v60 = vpack.c.bf16 %v193_v55, %v189_v54  ;;  %v188_v61 = vld [vmem:[#allocation5 + $0x280] sm:$0xff]  ;;  %v190_v63 = vld [vmem:[#allocation5 + $0x290] sm:$0xff] }
  0x79   :  { %1330 = vmatpush1.bf16.msra.mxu0 %v1329_v22  ;;  %v192_v62 = vld [vmem:[#allocation5 + $0x2a0] sm:$0xff]  ;;  %v1407_v0 = vpack.c.bf16 %v195_v57, %v191_v56  ;;  %v194_v1 = vld [vmem:[#allocation5 + $0x2b0] sm:$0xff]  ;;  %v197_v2 = vld [vmem:[#allocation5 + $0x2c8] sm:$0xff] }
  0x7a   :  { %1394 = vmatpush1.bf16.msra.mxu1 %v1393_v23  ;;  %1332 = vmatprep.subr.bf16.mxu0 %v1331_v24  ;;  %v201_v3 = vld [vmem:[#allocation5 + $0x2e8] sm:$0xff]  ;;  %v199_v4 = vld [vmem:[#allocation5 + $0x2d8] sm:$0xff]  ;;  %v1345_v6 = vpack.c.bf16 %v192_v62, %v188_v61  ;;  %v196_v7 = vld [vmem:[#allocation5 + $0x2c0] sm:$0xff]  ;;  %v1409_v8 = vpack.c.bf16 %v194_v1, %v190_v63 }
  0x7b   :  { %1396 = vmatprep.subr.bf16.mxu1 %v1395_v28  ;;  %v203_v5 = vld [vmem:[#allocation5 + $0x2f8] sm:$0xff]  ;;  %v1347_v9 = vpack.c.bf16 %v201_v3, %v197_v2  ;;  %v200_v10 = vld [vmem:[#allocation5 + $0x2e0] sm:$0xff]  ;;  %v198_v11 = vld [vmem:[#allocation5 + $0x2d0] sm:$0xff] }
  0x7c   :  { %v202_v12 = vld [vmem:[#allocation5 + $0x2f0] sm:$0xff]  ;;  %v1411_v13 = vpack.c.bf16 %v203_v5, %v199_v4  ;;  %v205_v14 = vld [vmem:[#allocation5 + $0x308] sm:$0xff]  ;;  %v207_v17 = vld [vmem:[#allocation5 + $0x318] sm:$0xff]  ;;  %v1349_v19 = vpack.c.bf16 %v200_v10, %v196_v7 }
  0x7d   :  { %1334 = vmatpush1.bf16.msra.mxu0 %v1333_v34  ;;  %v209_v15 = vld [vmem:[#allocation5 + $0x328] sm:$0xff]  ;;  %v211_v18 = vld [vmem:[#allocation5 + $0x338] sm:$0xff]  ;;  %v1413_v20 = vpack.c.bf16 %v202_v12, %v198_v11  ;;  %v204_v22 = vld [vmem:[#allocation5 + $0x300] sm:$0xff] }
  0x7e   :  { %1398 = vmatpush1.bf16.msra.mxu1 %v1397_v35  ;;  %1336 = vmatprep.subr.bf16.mxu0 %v1335_v36  ;;  %v105_v16 = vld [vmem:[#allocation2 + $0x8] sm:$0xff]  ;;  %v1351_v21 = vpack.c.bf16 %v209_v15, %v205_v14  ;;  %v208_v23 = vld [vmem:[#allocation5 + $0x320] sm:$0xff]  ;;  %v206_v24 = vld [vmem:[#allocation5 + $0x310] sm:$0xff]  ;;  %v1415_v25 = vpack.c.bf16 %v211_v18, %v207_v17 }
  0x7f   :  { %1400 = vmatprep.subr.bf16.mxu1 %v1399_v40  ;;  %322 = vmatprep.mubr.f32.mxu0 %v105_v16  ;;  %v210_v26 = vld [vmem:[#allocation5 + $0x330] sm:$0xff]  ;;  %v213_v27 = vld [vmem:[#allocation5 + $0x348] sm:$0xff]  ;;  %v215_v29 = vld [vmem:[#allocation5 + $0x358] sm:$0xff]  ;;  %v1353_v31 = vpack.c.bf16 %v208_v23, %v204_v22 }
  0x80   :  { %399 = vmatprep.mubr.f32.mxu1 %v105_v16  ;;  %v217_v28 = vld [vmem:[#allocation5 + $0x368] sm:$0xff]  ;;  %v219_v30 = vld [vmem:[#allocation5 + $0x378] sm:$0xff]  ;;  %v1417_v32 = vpack.c.bf16 %v210_v26, %v206_v24  ;;  %v212_v34 = vld [vmem:[#allocation5 + $0x340] sm:$0xff] }
  0x81   :  { %1338 = vmatpush1.bf16.msra.mxu0 %v1337_v46  ;;  %v1355_v33 = vpack.c.bf16 %v217_v28, %v213_v27  ;;  %v216_v35 = vld [vmem:[#allocation5 + $0x360] sm:$0xff]  ;;  %v214_v36 = vld [vmem:[#allocation5 + $0x350] sm:$0xff]  ;;  %v1419_v37 = vpack.c.bf16 %v219_v30, %v215_v29  ;;  %v221_v39 = vld [vmem:[#allocation5 + $0x388] sm:$0xff] }
  0x82   :  { %1402 = vmatpush1.bf16.msra.mxu1 %v1401_v47  ;;  %1340 = vmatprep.subr.bf16.mxu0 %v1339_v48  ;;  %v218_v38 = vld [vmem:[#allocation5 + $0x370] sm:$0xff]  ;;  %v225_v40 = vld [vmem:[#allocation5 + $0x3a8] sm:$0xff]  ;;  %v223_v41 = vld [vmem:[#allocation5 + $0x398] sm:$0xff]  ;;  %v1357_v43 = vpack.c.bf16 %v216_v35, %v212_v34 }
  0x83   :  { %1404 = vmatprep.subr.bf16.mxu1 %v1403_v52  ;;  %v227_v42 = vld [vmem:[#allocation5 + $0x3b8] sm:$0xff]  ;;  %v1421_v44 = vpack.c.bf16 %v218_v38, %v214_v36  ;;  %v1359_v45 = vpack.c.bf16 %v225_v40, %v221_v39  ;;  %v220_v46 = vld [vmem:[#allocation5 + $0x380] sm:$0xff]  ;;  %v222_v48 = vld [vmem:[#allocation5 + $0x390] sm:$0xff] }
  0x84   :  { %v224_v47 = vld [vmem:[#allocation5 + $0x3a0] sm:$0xff]  ;;  %v1423_v49 = vpack.c.bf16 %v227_v42, %v223_v41  ;;  %v226_v50 = vld [vmem:[#allocation5 + $0x3b0] sm:$0xff]  ;;  %v229_v51 = vld [vmem:[#allocation5 + $0x3c8] sm:$0xff] }
  0x85   :  { %1342 = vmatpush1.bf16.msra.mxu0 %v1341_v58  ;;  %v233_v52 = vld [vmem:[#allocation5 + $0x3e8] sm:$0xff]  ;;  %v231_v53 = vld [vmem:[#allocation5 + $0x3d8] sm:$0xff]  ;;  %v1361_v55 = vpack.c.bf16 %v224_v47, %v220_v46  ;;  %v1425_v56 = vpack.c.bf16 %v226_v50, %v222_v48  ;;  %v228_v58 = vld [vmem:[#allocation5 + $0x3c0] sm:$0xff] }
  0x86   :  { %1406 = vmatpush1.bf16.msra.mxu1 %v1405_v59  ;;  %1344 = vmatprep.subr.bf16.mxu0 %v1343_v60  ;;  %v235_v54 = vld [vmem:[#allocation5 + $0x3f8] sm:$0xff]  ;;  %v1363_v57 = vpack.c.bf16 %v233_v52, %v229_v51  ;;  %v232_v59 = vld [vmem:[#allocation5 + $0x3e0] sm:$0xff]  ;;  %v230_v60 = vld [vmem:[#allocation5 + $0x3d0] sm:$0xff] }
  0x87   :  { %1408 = vmatprep.subr.bf16.mxu1 %v1407_v0  ;;  %v1427_v61 = vpack.c.bf16 %v235_v54, %v231_v53  ;;  %v234_v62 = vld [vmem:[#allocation5 + $0x3f0] sm:$0xff]  ;;  %v436_v63 = vld [vmem:[#allocation7 + $0x80] sm:$0xff]  ;;  %v437_v0 = vld [vmem:[#allocation7 + $0x88] sm:$0xff]  ;;  %v1365_v3 = vpack.c.bf16 %v232_v59, %v228_v58 }
  0x88   :  { %v468_v1 = vld [vmem:[#allocation7 + $0x180] sm:$0xff]  ;;  %v469_v2 = vld [vmem:[#allocation7 + $0x188] sm:$0xff]  ;;  %v1429_v4 = vpack.c.bf16 %v234_v62, %v230_v60  ;;  %v1431_v5 = vpack.c.bf16 %v437_v0, %v436_v63  ;;  %v438_v11 = vld [vmem:[#allocation7 + $0x90] sm:$0xff] }
  0x89   :  { %1346 = vmatpush1.bf16.msra.mxu0 %v1345_v6  ;;  %v1463_v6 = vpack.c.bf16 %v469_v2, %v468_v1  ;;  %v420_v7 = vld [vmem:[#allocation7] sm:$0xff]  ;;  %v453_v10 = vld [vmem:[#allocation7 + $0x108] sm:$0xff]  ;;  %v439_v12 = vld [vmem:[#allocation7 + $0x98] sm:$0xff] }
  0x8a   :  { %1410 = vmatpush1.bf16.msra.mxu1 %v1409_v8  ;;  %1348 = vmatprep.subr.bf16.mxu0 %v1347_v9  ;;  %v421_v8 = vld [vmem:[#allocation7 + $0x8] sm:$0xff]  ;;  %v452_v9 = vld [vmem:[#allocation7 + $0x100] sm:$0xff]  ;;  %v470_v14 = vld [vmem:[#allocation7 + $0x190] sm:$0xff] }
  0x8b   :  { %1412 = vmatprep.subr.bf16.mxu1 %v1411_v13  ;;  %v104_v13 = vld [vmem:[#allocation2] sm:$0xff]  ;;  %v471_v15 = vld [vmem:[#allocation7 + $0x198] sm:$0xff]  ;;  %v1433_v17 = vpack.c.bf16 %v421_v8, %v420_v7  ;;  %v1465_v18 = vpack.c.bf16 %v453_v10, %v452_v9  ;;  %v454_v22 = vld [vmem:[#allocation7 + $0x110] sm:$0xff] }
  0x8c   :  { %v107_v16 = vld [vmem:[#allocation2 + $0x18] sm:$0xff]  ;;  %v1467_v23 = vpack.c.bf16 %v471_v15, %v470_v14  ;;  %v441_v26 = vld [vmem:[#allocation7 + $0xa8] sm:$0xff]  ;;  %v106_v27 = vld [vmem:[#allocation2 + $0x10] sm:$0xff] }
  0x8d   :  { %1350 = vmatpush1.bf16.msra.mxu0 %v1349_v19  ;;  %v1435_v19 = vpack.c.bf16 %v439_v12, %v438_v11  ;;  %v455_v24 = vld [vmem:[#allocation7 + $0x118] sm:$0xff]  ;;  %v472_v28 = vld [vmem:[#allocation7 + $0x1a0] sm:$0xff]  ;;  %v473_v29 = vld [vmem:[#allocation7 + $0x1a8] sm:$0xff] }
  0x8e   :  { %1414 = vmatpush1.bf16.msra.mxu1 %v1413_v20  ;;  %1352 = vmatprep.subr.bf16.mxu0 %v1351_v21  ;;  %v422_v20 = vld [vmem:[#allocation7 + $0x10] sm:$0xff]  ;;  %v423_v21 = vld [vmem:[#allocation7 + $0x18] sm:$0xff]  ;;  %v425_v34 = vld [vmem:[#allocation7 + $0x28] sm:$0xff]  ;;  %v1471_v36 = vpack.c.bf16 %v473_v29, %v472_v28 }
  0x8f   :  { %1416 = vmatprep.subr.bf16.mxu1 %v1415_v25  ;;  %v440_v25 = vld [vmem:[#allocation7 + $0xa0] sm:$0xff]  ;;  %v1437_v30 = vpack.c.bf16 %v423_v21, %v422_v20  ;;  %v442_v38 = vld [vmem:[#allocation7 + $0xb0] sm:$0xff]  ;;  %v443_v39 = vld [vmem:[#allocation7 + $0xb8] sm:$0xff] }
  0x90   :  { %v456_v35 = vld [vmem:[#allocation7 + $0x120] sm:$0xff]  ;;  %v474_v40 = vld [vmem:[#allocation7 + $0x1b0] sm:$0xff]  ;;  %v475_v41 = vld [vmem:[#allocation7 + $0x1b8] sm:$0xff] }
  0x91   :  { %1354 = vmatpush1.bf16.msra.mxu0 %v1353_v31  ;;  %v1469_v31 = vpack.c.bf16 %v455_v24, %v454_v22  ;;  %v427_v46 = vld [vmem:[#allocation7 + $0x38] sm:$0xff]  ;;  %v458_v47 = vld [vmem:[#allocation7 + $0x130] sm:$0xff]  ;;  %v1475_v48 = vpack.c.bf16 %v475_v41, %v474_v40  ;;  %v444_v50 = vld [vmem:[#allocation7 + $0xc0] sm:$0xff] }
  0x92   :  { %1418 = vmatpush1.bf16.msra.mxu1 %v1417_v32  ;;  %1356 = vmatprep.subr.bf16.mxu0 %v1355_v33  ;;  %v1439_v32 = vpack.c.bf16 %v441_v26, %v440_v25  ;;  %v424_v33 = vld [vmem:[#allocation7 + $0x20] sm:$0xff]  ;;  %v445_v51 = vld [vmem:[#allocation7 + $0xc8] sm:$0xff]  ;;  %v446_v62 = vld [vmem:[#allocation7 + $0xd0] sm:$0xff] }
  0x93   :  { %1420 = vmatprep.subr.bf16.mxu1 %v1419_v37  ;;  %v457_v37 = vld [vmem:[#allocation7 + $0x128] sm:$0xff]  ;;  %v1441_v42 = vpack.c.bf16 %v425_v34, %v424_v33  ;;  %v476_v52 = vld [vmem:[#allocation7 + $0x1c0] sm:$0xff]  ;;  %v447_v63 = vld [vmem:[#allocation7 + $0xd8] sm:$0xff] }
  0x94   :  { %v477_v53 = vld [vmem:[#allocation7 + $0x1c8] sm:$0xff]  ;;  %v460_v59 = vld [vmem:[#allocation7 + $0x140] sm:$0xff]  ;;  %v478_v0 = vld [vmem:[#allocation7 + $0x1d0] sm:$0xff] }
  0x95   :  { %1358 = vmatpush1.bf16.msra.mxu0 %v1357_v43  ;;  %v1473_v43 = vpack.c.bf16 %v457_v37, %v456_v35  ;;  %v429_v58 = vld [vmem:[#allocation7 + $0x48] sm:$0xff]  ;;  %v1479_v60 = vpack.c.bf16 %v477_v53, %v476_v52  ;;  %v479_v1 = vld [vmem:[#allocation7 + $0x1d8] sm:$0xff]  ;;  %v462_v7 = vld [vmem:[#allocation7 + $0x150] sm:$0xff] }
  0x96   :  { %1422 = vmatpush1.bf16.msra.mxu1 %v1421_v44  ;;  %1360 = vmatprep.subr.bf16.mxu0 %v1359_v45  ;;  %v1443_v44 = vpack.c.bf16 %v443_v39, %v442_v38  ;;  %v426_v45 = vld [vmem:[#allocation7 + $0x30] sm:$0xff]  ;;  %v1483_v8 = vpack.c.bf16 %v479_v1, %v478_v0  ;;  %v463_v9 = vld [vmem:[#allocation7 + $0x158] sm:$0xff]  ;;  %v448_v10 = vld [vmem:[#allocation7 + $0xe0] sm:$0xff] }
  0x97   :  { %1424 = vmatprep.subr.bf16.mxu1 %v1423_v49  ;;  %v459_v49 = vld [vmem:[#allocation7 + $0x138] sm:$0xff]  ;;  %v1445_v54 = vpack.c.bf16 %v427_v46, %v426_v45  ;;  %v449_v11 = vld [vmem:[#allocation7 + $0xe8] sm:$0xff]  ;;  %v480_v12 = vld [vmem:[#allocation7 + $0x1e0] sm:$0xff]  ;;  %v1485_v15 = vpack.c.bf16 %v463_v9, %v462_v7 }
  0x98   :  { %v464_v20 = vld [vmem:[#allocation7 + $0x160] sm:$0xff]  ;;  %v465_v22 = vld [vmem:[#allocation7 + $0x168] sm:$0xff]  ;;  %v450_v24 = vld [vmem:[#allocation7 + $0xf0] sm:$0xff] }
  0x99   :  { %1362 = vmatpush1.bf16.msra.mxu0 %v1361_v55  ;;  %v1477_v55 = vpack.c.bf16 %v459_v49, %v458_v47  ;;  %v451_v25 = vld [vmem:[#allocation7 + $0xf8] sm:$0xff]  ;;  %v482_v26 = vld [vmem:[#allocation7 + $0x1f0] sm:$0xff]  ;;  %v646_v37 = vld [vmem:[#allocation8 + $0x28] sm:$0xff] }
  0x9a   :  { %1426 = vmatpush1.bf16.msra.mxu1 %v1425_v56  ;;  %1364 = vmatprep.subr.bf16.mxu0 %v1363_v57  ;;  %v1447_v56 = vpack.c.bf16 %v445_v51, %v444_v50  ;;  %v428_v57 = vld [vmem:[#allocation7 + $0x40] sm:$0xff]  ;;  %v483_v28 = vld [vmem:[#allocation7 + $0x1f8] sm:$0xff]  ;;  %v434_v29 = vld [vmem:[#allocation7 + $0x70] sm:$0xff] }
  0x9b   :  { %1428 = vmatprep.subr.bf16.mxu1 %v1427_v61  ;;  %v461_v61 = vld [vmem:[#allocation7 + $0x148] sm:$0xff]  ;;  %v1449_v2 = vpack.c.bf16 %v429_v58, %v428_v57  ;;  %v466_v33 = vld [vmem:[#allocation7 + $0x170] sm:$0xff]  ;;  %v467_v34 = vld [vmem:[#allocation7 + $0x178] sm:$0xff] }
  0x9c   :  { %v1493_v35 = vpack.c.bf16 %v467_v34, %v466_v33  ;;  %v644_v38 = vld [vmem:[#allocation8 + $0x18] sm:$0xff]  ;;  %v236_v45 = vld [vmem:[%s2002_s2] sm:$0xf]  ;;  %v650_v0 = vld [vmem:[#allocation8 + $0x48] sm:$0xff] }
  0x9d   :  { %1366 = vmatpush1.bf16.msra.mxu0 %v1365_v3  ;;  %v1481_v3 = vpack.c.bf16 %v461_v61, %v460_v59  ;;  %v648_v40 = vld [vmem:[#allocation8 + $0x38] sm:$0xff]  ;;  %v645_v58 = vld [vmem:[#allocation8 + $0x20] sm:$0xff]  ;;  %v643_v59 = vld [vmem:[#allocation8 + $0x10] sm:$0xff] }
  0x9e   :  { %1430 = vmatpush1.bf16.msra.mxu1 %v1429_v4  ;;  %1432 = vmatprep.subr.bf16.mxu0 %v1431_v5  ;;  %v1451_v4 = vpack.c.bf16 %v447_v63, %v446_v62  ;;  %v430_v5 = vld [vmem:[#allocation7 + $0x50] sm:$0xff]  ;;  %v1527_v41 = vpack.c.bf16 %v648_v40, %v644_v38  ;;  %v654_v1 = vld [vmem:[#allocation8 + $0x68] sm:$0xff] }
  0x9f   :  { %1464 = vmatprep.subr.bf16.mxu1 %v1463_v6  ;;  %v431_v6 = vld [vmem:[#allocation7 + $0x58] sm:$0xff]  ;;  %v659_v38 = vld [vmem:[#allocation8 + $0x90] sm:$0xff] }
  0xa0   :  { %323 = vmatmul.mubr.f32.vlgmr.msra.gmra.mrb[0].mxu0 %v104_v13  ;;  %v1453_v14 = vpack.c.bf16 %v431_v6, %v430_v5  ;;  %v663_v40 = vld [vmem:[#allocation8 + $0xb0] sm:$0xff] }
  0xa1   :  { %400 = vmatmul.mubr.f32.vlgmr.msra.gmra.mrb[0].mxu1 %v104_v13  ;;  %328 = vmatprep.mubr.f32.mxu0 %v107_v16  ;;  %v481_v13 = vld [vmem:[#allocation7 + $0x1e8] sm:$0xff] }
  0xa2   :  { %405 = vmatprep.mubr.f32.mxu1 %v107_v16  ;;  %1434 = vmatpush3.bf16.msra.mxu0 %v1433_v17  ;;  %v1455_v16 = vpack.c.bf16 %v449_v11, %v448_v10  ;;  %v1487_v17 = vpack.c.bf16 %v481_v13, %v480_v12  ;;  %v649_v10 = vld [vmem:[#allocation8 + $0x40] sm:$0xff] }
  0xa3   :  { %1466 = vmatpush3.bf16.msra.mxu1 %v1465_v18  ;;  %1436 = vmatprep.subr.bf16.mxu0 %v1435_v19  ;;  %v432_v18 = vld [vmem:[#allocation7 + $0x60] sm:$0xff]  ;;  %v433_v19 = vld [vmem:[#allocation7 + $0x68] sm:$0xff] }
  0xa4   :  { %329 = vmatmul.mubr.f32.gmra.mrb[2].mxu0 %v106_v27  ;;  %1468 = vmatprep.subr.bf16.mxu1 %v1467_v23  ;;  %v1457_v21 = vpack.c.bf16 %v433_v19, %v432_v18  ;;  %v1489_v23 = vpack.c.bf16 %v465_v22, %v464_v20  ;;  %v651_v18 = vld [vmem:[#allocation8 + $0x50] sm:$0xff] }
  0xa5   :  { %406 = vmatmul.mubr.f32.gmra.mrb[2].mxu1 %v106_v27  ;;  %v1459_v27 = vpack.c.bf16 %v451_v25, %v450_v24  ;;  %v658_v24 = vld [vmem:[#allocation8 + $0x88] sm:$0xff] }
  0xa6   :  { %1438 = vmatpush3.bf16.msra.mxu0 %v1437_v30  ;;  %v435_v30 = vld [vmem:[#allocation7 + $0x78] sm:$0xff]  ;;  %v662_v25 = vld [vmem:[#allocation8 + $0xa8] sm:$0xff] }
  0xa7   :  { %1470 = vmatpush3.bf16.msra.mxu1 %v1469_v31  ;;  %1440 = vmatprep.subr.bf16.mxu0 %v1439_v32  ;;  %v1491_v31 = vpack.c.bf16 %v483_v28, %v482_v26  ;;  %v1461_v32 = vpack.c.bf16 %v435_v30, %v434_v29  ;;  %v664_v28 = vld [vmem:[#allocation8 + $0xb8] sm:$0xff] }
  0xa8   :  { %1472 = vmatprep.subr.bf16.mxu1 %v1471_v36  ;;  %v642_v36 = vld [vmem:[#allocation8 + $0x8] sm:$0xff] }
  0xa9   :  { %v1495_v39 = vpack.c.bf16 %v646_v37, %v642_v36  ;;  %v657_v36 = vld [vmem:[#allocation8 + $0x80] sm:$0xff] }
  0xaa   :  { %1442 = vmatpush3.bf16.msra.mxu0 %v1441_v42  ;;  %v238_v42 = vlaneseq  ;;  %v661_v37 = vld [vmem:[#allocation8 + $0xa0] sm:$0xff] }
  0xab   :  { %1474 = vmatpush3.bf16.msra.mxu1 %v1473_v43  ;;  %1444 = vmatprep.subr.bf16.mxu0 %v1443_v44 }
  0xac   :  { %1476 = vmatprep.subr.bf16.mxu1 %v1475_v48  ;;  %v1936_v43 = vshrl.u32 %v238_v42, 7  ;;  %v670_v42 = vld [vmem:[#allocation8 + $0xe8] sm:$0xff] }
  0xae   :  { %1446 = vmatpush3.bf16.msra.mxu0 %v1445_v54  ;;  %v240_v44 = vsub.s32 0, %v1936_v43  ;;  %v248_v46 = vsub.s32 2, %v1936_v43  ;;  %v244_v47 = vsub.s32 1, %v1936_v43  ;;  %v252_v48 = vsub.s32 3, %v1936_v43  ;;  %v641_v54 = vld [vmem:[#allocation8] sm:$0xff] }
  0xaf   :  { %1478 = vmatpush3.bf16.msra.mxu1 %v1477_v55  ;;  %1448 = vmatprep.subr.bf16.mxu0 %v1447_v56 }
  0xb0   :  { %1480 = vmatprep.subr.bf16.mxu1 %v1479_v60  ;;  %v241_v49 = vrot.slane %v236_v45, %v240_v44  ;;  %v249_v50 = vrot.slane %v236_v45, %v248_v46  ;;  %v245_v51 = vrot.slane %v236_v45, %v244_v47  ;;  %v253_v52 = vrot.slane %v236_v45, %v252_v48  ;;  %v647_v60 = vld [vmem:[#allocation8 + $0x30] sm:$0xff]  ;;  %v668_v45 = vld [vmem:[#allocation8 + $0xd8] sm:$0xff] }
  0xb1   :  { %v1529_v9 = vpack.c.bf16 %v647_v60, %v643_v59  ;;  %v678_v59 = vld [vmem:[#allocation8 + $0x128] sm:$0xff]  ;;  %v676_v60 = vld [vmem:[#allocation8 + $0x118] sm:$0xff] }
  0xb2   :  { %1450 = vmatpush3.bf16.msra.mxu0 %v1449_v2 }
  0xb3   :  { %1482 = vmatpush3.bf16.msra.mxu1 %v1481_v3  ;;  %1452 = vmatprep.subr.bf16.mxu0 %v1451_v4  ;;  %v652_v3 = vld [vmem:[#allocation8 + $0x58] sm:$0xff] }
  0xb4   :  { %1484 = vmatprep.subr.bf16.mxu1 %v1483_v8  ;;  %v656_v4 = vld [vmem:[#allocation8 + $0x78] sm:$0xff]  ;;  %v1497_v8 = vpack.c.bf16 %v645_v58, %v641_v54  ;;  %v669_v54 = vld [vmem:[#allocation8 + $0xe0] sm:$0xff]  ;;  %v674_v58 = vld [vmem:[#allocation8 + $0x108] sm:$0xff] }
  0xb5   :  { %v1531_v22 = vpack.c.bf16 %v656_v4, %v652_v3  ;;  %v675_v3 = vld [vmem:[#allocation8 + $0x110] sm:$0xff] }
  0xb6   :  { %1454 = vmatpush3.bf16.msra.mxu0 %v1453_v14 }
  0xb7   :  { %1486 = vmatpush3.bf16.msra.mxu1 %v1485_v15  ;;  %1456 = vmatprep.subr.bf16.mxu0 %v1455_v16  ;;  %v1499_v16 = vpack.c.bf16 %v654_v1, %v650_v0  ;;  %v1511_v0 = vpack.c.bf16 %v678_v59, %v674_v58  ;;  %v673_v1 = vld [vmem:[#allocation8 + $0x100] sm:$0xff] }
  0xb8   :  { %1488 = vmatprep.subr.bf16.mxu1 %v1487_v17  ;;  %v653_v17 = vld [vmem:[#allocation8 + $0x60] sm:$0xff] }
  0xb9   :  { %v1149_v58 = vld [vmem:[%s2004_s4] ss:$0 sm:$0xff] }
  0xba   :  { %1458 = vmatpush3.bf16.msra.mxu0 %v1457_v21 }
  0xbb   :  { %1490 = vmatpush3.bf16.msra.mxu1 %v1489_v23  ;;  %1460 = vmatprep.subr.bf16.mxu0 %v1459_v27  ;;  %v655_v23 = vld [vmem:[#allocation8 + $0x70] sm:$0xff]  ;;  %v660_v27 = vld [vmem:[#allocation8 + $0x98] sm:$0xff] }
  0xbc   :  { %1492 = vmatprep.subr.bf16.mxu1 %v1491_v31  ;;  %v1501_v31 = vpack.c.bf16 %v653_v17, %v649_v10  ;;  %v1533_v34 = vpack.c.bf16 %v655_v23, %v651_v18  ;;  %v687_v17 = vld [vmem:[#allocation8 + $0x170] sm:$0xff] }
  0xbe   :  { %1462 = vmatpush3.bf16.msra.mxu0 %v1461_v32 }
  0xbf   :  { %1494 = vmatpush3.bf16.msra.mxu1 %v1493_v35  ;;  %1496 = vmatprep.subr.bf16.mxu0 %v1495_v39  ;;  %v1503_v35 = vpack.c.bf16 %v662_v25, %v658_v24  ;;  %v1535_v39 = vpack.c.bf16 %v664_v28, %v660_v27  ;;  %v696_v24 = vld [vmem:[#allocation8 + $0x1b8] sm:$0xff]  ;;  %v689_v25 = vld [vmem:[#allocation8 + $0x180] sm:$0xff] }
  0xc0   :  { %1528 = vmatprep.subr.bf16.mxu1 %v1527_v41  ;;  %v666_v41 = vld [vmem:[#allocation8 + $0xc8] sm:$0xff] }
 0x173   :  { %v324_v53 = vpop.f32.mrb[0].mxu0 }
 0x174   :  { %v325_v55 = vadd.f32 %v324_v53, %v241_v49  ;;  %v401_v56 = vpop.f32.mrb[0].mxu1  ;;  %v326_v57 = vpop.f32.mrb[1].mxu0  ;;  %v665_v53 = vld [vmem:[#allocation8 + $0xc0] sm:$0xff] }
 0x175   :  { %v402_v61 = vadd.f32 %v401_v56, %v249_v50  ;;  %v327_v62 = vadd.f32 %v326_v57, %v245_v51  ;;  %v403_v63 = vpop.f32.mrb[1].mxu1  ;;  %v671_v57 = vld [vmem:[#allocation8 + $0xf0] sm:$0xff] }
 0x176   :  { %v404_v2 = vadd.f32 %v403_v63, %v253_v52  ;;  %v412_v11 = vmax.f32 %v325_v55, 0.0  ;;  %v667_v55 = vld [vmem:[#allocation8 + $0xd0] sm:$0xff] }
 0x177   :  { %v414_v5 = vmax.f32 %v402_v61, 0.0  ;;  %v413_v6 = vmax.f32 %v327_v62, 0.0  ;;  %v330_v7 = vpop.f32.mrb[2].mxu0  ;;  %v680_v61 = vld [vmem:[#allocation8 + $0x138] sm:$0xff]  ;;  %v1509_v62 = vpack.c.bf16 %v669_v54, %v665_v53  ;;  %v1541_v63 = vpack.c.bf16 %v671_v57, %v667_v55  ;;  %v938_v54 = vld [vmem:[#allocation10 + $0x188] sm:$0xff] }
 0x178   :  { %v415_v12 = vmax.f32 %v404_v2, 0.0  ;;  %v331_v13 = vadd.f32 %v330_v7, %v241_v49  ;;  %v407_v14 = vpop.f32.mrb[2].mxu1  ;;  %v332_v15 = vpop.f32.mrb[3].mxu0  ;;  %v672_v49 = vld [vmem:[#allocation8 + $0xf8] sm:$0xff]  ;;  %v677_v2 = vld [vmem:[#allocation8 + $0x120] sm:$0xff]  ;;  %v1543_v4 = vpack.c.bf16 %v680_v61, %v676_v60  ;;  %v686_v7 = vld [vmem:[#allocation8 + $0x168] sm:$0xff] }
 0x179   :  { %v408_v19 = vadd.f32 %v407_v14, %v249_v50  ;;  %v333_v20 = vadd.f32 %v332_v15, %v245_v51  ;;  %v409_v21 = vpop.f32.mrb[3].mxu1  ;;  %555 = vmatprep.mubr.f32.mxu0 %v413_v6  ;;  %v1505_v50 = vpack.c.bf16 %v661_v37, %v657_v36  ;;  %v1537_v51 = vpack.c.bf16 %v663_v40, %v659_v38  ;;  %v682_v6 = vld [vmem:[#allocation8 + $0x148] sm:$0xff]  ;;  %v685_v14 = vld [vmem:[#allocation8 + $0x160] sm:$0xff]  ;;  %v704_v36 = vld [vmem:[#allocation8 + $0x1f8] sm:$0xff] }
 0x17a   :  { %v410_v26 = vadd.f32 %v409_v21, %v253_v52  ;;  %630 = vmatprep.mubr.f32.mxu1 %v415_v12  ;;  %556 = vmatmul.mubr.f32.vlgmr.msra.gmra.mrb[4].mxu0 %v412_v11  ;;  %v416_v32 = vmax.f32 %v331_v13, 0.0  ;;  %v1507_v52 = vpack.c.bf16 %v670_v42, %v666_v41  ;;  %v1539_v56 = vpack.c.bf16 %v672_v49, %v668_v45  ;;  %v681_v13 = vld [vmem:[#allocation8 + $0x140] sm:$0xff]  ;;  %v694_v21 = vld [vmem:[#allocation8 + $0x1a8] sm:$0xff]  ;;  %v699_v41 = vld [vmem:[#allocation8 + $0x1d0] sm:$0xff] }
 0x17b   :  { %v418_v29 = vmax.f32 %v408_v19, 0.0  ;;  %v417_v30 = vmax.f32 %v333_v20, 0.0  ;;  %631 = vmatmul.mubr.f32.vlgmr.msra.gmra.mrb[4].mxu1 %v414_v5  ;;  %1498 = vmatpush1.bf16.msra.mxu0 %v1497_v8  ;;  %v679_v5 = vld [vmem:[#allocation8 + $0x130] sm:$0xff]  ;;  %v684_v8 = vld [vmem:[#allocation8 + $0x158] sm:$0xff]  ;;  %v1513_v10 = vpack.c.bf16 %v677_v2, %v673_v1  ;;  %v1515_v12 = vpack.c.bf16 %v686_v7, %v682_v6  ;;  %v690_v20 = vld [vmem:[#allocation8 + $0x188] sm:$0xff] }
 0x17c   :  { %v419_v33 = vmax.f32 %v410_v26, 0.0  ;;  %1530 = vmatpush1.bf16.msra.mxu1 %v1529_v9  ;;  %1500 = vmatprep.subr.bf16.mxu0 %v1499_v16  ;;  %v688_v9 = vld [vmem:[#allocation8 + $0x178] sm:$0xff]  ;;  %v1545_v11 = vpack.c.bf16 %v679_v5, %v675_v3  ;;  %v683_v16 = vld [vmem:[#allocation8 + $0x150] sm:$0xff]  ;;  %v1517_v18 = vpack.c.bf16 %v685_v14, %v681_v13  ;;  %v1519_v23 = vpack.c.bf16 %v694_v21, %v690_v20  ;;  %v693_v26 = vld [vmem:[#allocation8 + $0x1a0] sm:$0xff] }
 0x17d   :  { %560 = vmatprep.mubr.f32.mxu0 %v417_v30  ;;  %1532 = vmatprep.subr.bf16.mxu1 %v1531_v22  ;;  %v1547_v15 = vpack.c.bf16 %v688_v9, %v684_v8  ;;  %v1549_v19 = vpack.c.bf16 %v687_v17, %v683_v16  ;;  %v692_v22 = vld [vmem:[#allocation8 + $0x198] sm:$0xff]  ;;  %v1521_v28 = vpack.c.bf16 %v693_v26, %v689_v25  ;;  %v695_v30 = vld [vmem:[#allocation8 + $0x1b0] sm:$0xff]  ;;  %v697_v37 = vld [vmem:[#allocation8 + $0x1c0] sm:$0xff]  ;;  %v1812_v49 = vmov 0.0  }
 0x17e   :  { %635 = vmatprep.mubr.f32.mxu1 %v419_v33  ;;  %561 = vmatmul.mubr.f32.gmra.mrb[6].mxu0 %v416_v32  ;;  %v1551_v27 = vpack.c.bf16 %v696_v24, %v692_v22  ;;  %v698_v32 = vld [vmem:[#allocation8 + $0x1c8] sm:$0xff]  ;;  %v701_v38 = vld [vmem:[#allocation8 + $0x1e0] sm:$0xff]  ;;  %v703_v42 = vld [vmem:[#allocation8 + $0x1f0] sm:$0xff] }
 0x17f   :  { %636 = vmatmul.mubr.f32.gmra.mrb[6].mxu1 %v418_v29  ;;  %1502 = vmatpush1.bf16.msra.mxu0 %v1501_v31  ;;  %v691_v29 = vld [vmem:[#allocation8 + $0x190] sm:$0xff]  ;;  %v702_v33 = vld [vmem:[#allocation8 + $0x1e8] sm:$0xff]  ;;  %v1525_v40 = vpack.c.bf16 %v701_v38, %v697_v37  ;;  %v1557_v45 = vpack.c.bf16 %v703_v42, %v699_v41  ;;  %v921_v1 = vld [vmem:[#allocation10 + $0x100] sm:$0xff] }
 0x180   :  { %1534 = vmatpush1.bf16.msra.mxu1 %v1533_v34  ;;  %1504 = vmatprep.subr.bf16.mxu0 %v1503_v35  ;;  %v1553_v31 = vpack.c.bf16 %v695_v30, %v691_v29  ;;  %v700_v34 = vld [vmem:[#allocation8 + $0x1d8] sm:$0xff]  ;;  %v1523_v35 = vpack.c.bf16 %v702_v33, %v698_v32  ;;  %v922_v2 = vld [vmem:[#allocation10 + $0x108] sm:$0xff]  ;;  %v907_v3 = vld [vmem:[#allocation10 + $0x90] sm:$0xff] }
 0x181   :  { %1536 = vmatprep.subr.bf16.mxu1 %v1535_v39  ;;  %v1555_v39 = vpack.c.bf16 %v704_v36, %v700_v34  ;;  %791 = vmatprep.mubr.f32.mxu0 %v1812_v49  ;;  %v908_v6 = vld [vmem:[#allocation10 + $0x98] sm:$0xff]  ;;  %v939_v7 = vld [vmem:[#allocation10 + $0x190] sm:$0xff]  ;;  %v910_v25 = vld [vmem:[#allocation10 + $0xa8] sm:$0xff] }
 0x182   :  { %868 = vmatprep.mubr.f32.mxu1 %v1812_v49  ;;  %v940_v8 = vld [vmem:[#allocation10 + $0x198] sm:$0xff]  ;;  %v891_v16 = vld [vmem:[#allocation10 + $0x10] sm:$0xff]  ;;  %v941_v26 = vld [vmem:[#allocation10 + $0x1a0] sm:$0xff] }
 0x183   :  { %1506 = vmatpush1.bf16.msra.mxu0 %v1505_v50  ;;  %v905_v50 = vld [vmem:[#allocation10 + $0x80] sm:$0xff]  ;;  %v892_v17 = vld [vmem:[#allocation10 + $0x18] sm:$0xff]  ;;  %v1595_v20 = vpack.c.bf16 %v940_v8, %v939_v7  ;;  %v923_v21 = vld [vmem:[#allocation10 + $0x110] sm:$0xff] }
 0x184   :  { %1538 = vmatpush1.bf16.msra.mxu1 %v1537_v51  ;;  %1508 = vmatprep.subr.bf16.mxu0 %v1507_v52  ;;  %v906_v51 = vld [vmem:[#allocation10 + $0x88] sm:$0xff]  ;;  %v937_v52 = vld [vmem:[#allocation10 + $0x180] sm:$0xff]  ;;  %v924_v22 = vld [vmem:[#allocation10 + $0x118] sm:$0xff]  ;;  %v1565_v29 = vpack.c.bf16 %v892_v17, %v891_v16 }
 0x185   :  { %1540 = vmatprep.subr.bf16.mxu1 %v1539_v56  ;;  %v1559_v53 = vpack.c.bf16 %v906_v51, %v905_v50  ;;  %v1591_v55 = vpack.c.bf16 %v938_v54, %v937_v52  ;;  %v1597_v30 = vpack.c.bf16 %v924_v22, %v923_v21  ;;  %v894_v32 = vld [vmem:[#allocation10 + $0x28] sm:$0xff]  ;;  %v911_v37 = vld [vmem:[#allocation10 + $0xb0] sm:$0xff]  ;;  %v912_v38 = vld [vmem:[#allocation10 + $0xb8] sm:$0xff] }
 0x186   :  { %v926_v36 = vld [vmem:[#allocation10 + $0x128] sm:$0xff]  ;;  %v1571_v50 = vpack.c.bf16 %v912_v38, %v911_v37  ;;  %v927_v52 = vld [vmem:[#allocation10 + $0x130] sm:$0xff]  ;;  %v913_v54 = vld [vmem:[#allocation10 + $0xc0] sm:$0xff] }
 0x187   :  { %1510 = vmatpush1.bf16.msra.mxu0 %v1509_v62  ;;  %v889_v62 = vld [vmem:[#allocation10] sm:$0xff]  ;;  %v899_v8 = vld [vmem:[#allocation10 + $0x50] sm:$0xff]  ;;  %v950_v17 = vld [vmem:[#allocation10 + $0x1e8] sm:$0xff] }
 0x188   :  { %1542 = vmatpush1.bf16.msra.mxu1 %v1541_v63  ;;  %1512 = vmatprep.subr.bf16.mxu0 %v1511_v0  ;;  %v890_v63 = vld [vmem:[#allocation10 + $0x8] sm:$0xff]  ;;  %v949_v16 = vld [vmem:[#allocation10 + $0x1e0] sm:$0xff]  ;;  %v935_v37 = vld [vmem:[#allocation10 + $0x170] sm:$0xff] }
 0x189   :  { %1544 = vmatprep.subr.bf16.mxu1 %v1543_v4  ;;  %v1561_v14 = vpack.c.bf16 %v890_v63, %v889_v62  ;;  %v1615_v21 = vpack.c.bf16 %v950_v17, %v949_v16  ;;  %v901_v22 = vld [vmem:[#allocation10 + $0x60] sm:$0xff]  ;;  %v936_v38 = vld [vmem:[#allocation10 + $0x178] sm:$0xff] }
 0x18b   :  { %1514 = vmatpush1.bf16.msra.mxu0 %v1513_v10 }
 0x18c   :  { %1546 = vmatpush1.bf16.msra.mxu1 %v1545_v11  ;;  %1516 = vmatprep.subr.bf16.mxu0 %v1515_v12 }
 0x18d   :  { %1548 = vmatprep.subr.bf16.mxu1 %v1547_v15  ;;  %v1593_v15 = vpack.c.bf16 %v922_v2, %v921_v1  ;;  %v930_v1 = vld [vmem:[#allocation10 + $0x148] sm:$0xff]  ;;  %v915_v2 = vld [vmem:[#allocation10 + $0xd0] sm:$0xff] }
 0x18f   :  { %1518 = vmatpush1.bf16.msra.mxu0 %v1517_v18 }
 0x190   :  { %1550 = vmatpush1.bf16.msra.mxu1 %v1549_v19  ;;  %1520 = vmatprep.subr.bf16.mxu0 %v1519_v23  ;;  %v1563_v19 = vpack.c.bf16 %v908_v6, %v907_v3  ;;  %v909_v23 = vld [vmem:[#allocation10 + $0xa0] sm:$0xff]  ;;  %v916_v3 = vld [vmem:[#allocation10 + $0xd8] sm:$0xff] }
 0x191   :  { %1552 = vmatprep.subr.bf16.mxu1 %v1551_v27  ;;  %v942_v27 = vld [vmem:[#allocation10 + $0x1a8] sm:$0xff]  ;;  %v1567_v33 = vpack.c.bf16 %v910_v25, %v909_v23 }
 0x192   :  { %v1599_v34 = vpack.c.bf16 %v942_v27, %v941_v26  ;;  %v902_v23 = vld [vmem:[#allocation10 + $0x68] sm:$0xff] }
 0x193   :  { %1522 = vmatpush1.bf16.msra.mxu0 %v1521_v28  ;;  %v1585_v25 = vpack.c.bf16 %v902_v23, %v901_v22  ;;  %v934_v26 = vld [vmem:[#allocation10 + $0x168] sm:$0xff] }
 0x194   :  { %1554 = vmatpush1.bf16.msra.mxu1 %v1553_v31  ;;  %1524 = vmatprep.subr.bf16.mxu0 %v1523_v35  ;;  %v893_v31 = vld [vmem:[#allocation10 + $0x20] sm:$0xff] }
 0x195   :  { %1556 = vmatprep.subr.bf16.mxu1 %v1555_v39  ;;  %v925_v35 = vld [vmem:[#allocation10 + $0x120] sm:$0xff]  ;;  %v943_v39 = vld [vmem:[#allocation10 + $0x1b0] sm:$0xff]  ;;  %v1569_v41 = vpack.c.bf16 %v894_v32, %v893_v31  ;;  %v952_v32 = vld [vmem:[#allocation10 + $0x1f8] sm:$0xff] }
 0x196   :  { %v1601_v42 = vpack.c.bf16 %v926_v36, %v925_v35 }
 0x197   :  { %1526 = vmatpush1.bf16.msra.mxu0 %v1525_v40  ;;  %v944_v40 = vld [vmem:[#allocation10 + $0x1b8] sm:$0xff] }
 0x198   :  { %1558 = vmatpush1.bf16.msra.mxu1 %v1557_v45  ;;  %1560 = vmatprep.subr.bf16.mxu0 %v1559_v53  ;;  %v895_v45 = vld [vmem:[#allocation10 + $0x30] sm:$0xff]  ;;  %v1603_v51 = vpack.c.bf16 %v944_v40, %v943_v39  ;;  %v928_v53 = vld [vmem:[#allocation10 + $0x138] sm:$0xff]  ;;  %v1621_v39 = vpack.c.bf16 %v936_v38, %v935_v37  ;;  %v705_v40 = vld [vmem:[%s2006_s6] sm:$0xf]  ;;  %s1813_s6 = smov [#allocation11]  }
 0x199   :  { %1592 = vmatprep.subr.bf16.mxu1 %v1591_v55  ;;  %v914_v55 = vld [vmem:[#allocation10 + $0xc8] sm:$0xff]  ;;  %s1119_s18 = sshll.u32 %s1813_s6, 4  ;;  %s1120_s18 = int_to_ptr.vmem [resolvable:$true] %s1119_s18 }
 0x19a   :  { %v1575_v62 = vpack.c.bf16 %v914_v55, %v913_v54  ;;  %s1747_s1 = scalar_lea.vmem %s1120_s18, 256  ;;  %p1752_p13 = scmp.lt.s32.totalorder %s1120_s18, %s1120_s18 }
 0x19b   :  { %p1748_p12 = scmp.ne.s32.totalorder %s1120_s18, %s1747_s1  ;;  %p1753_p0 = scmp.lt.s32.totalorder %s1747_s1, %s1747_s1 }
 0x19d   :  { %p1754_p1 = por %p1753_p0, %p1752_p13 }
 0x19f   :  { %p1755_p2 = pnand %p1754_p1, %p1748_p12 }
 0x24d   :  { %v1183_v56 = vpop.f32.mrb[4].mxu0 }
 0x24e   :  { %v1221_v57 = vpop.f32.mrb[4].mxu1  ;;  %v1184_v59 = vpop.f32.mrb[5].mxu0 }
 0x24f   :  { %v1185_v60 = vadd.f32 %v1184_v59, %v1183_v56  ;;  %v1222_v61 = vpop.f32.mrb[5].mxu1  ;;  %v945_v56 = vld [vmem:[#allocation10 + $0x1c0] sm:$0xff]  ;;  %v1605_v59 = vpack.c.bf16 %v928_v53, %v927_v52 }
 0x250   :  { %v1223_v0 = vadd.f32 %v1222_v61, %v1221_v57  ;;  %v946_v57 = vld [vmem:[#allocation10 + $0x1c8] sm:$0xff] }
 0x251   :  { %v558_v4 = vadd.f32 %v1185_v60, %v1149_v58  ;;  %v1186_v5 = vpop.f32.mrb[6].mxu0  ;;  %v897_v60 = vld [vmem:[#allocation10 + $0x40] sm:$0xff]  ;;  %v898_v61 = vld [vmem:[#allocation10 + $0x48] sm:$0xff]  ;;  %v1607_v63 = vpack.c.bf16 %v946_v57, %v945_v56 }
 0x252   :  { %v1224_v9 = vpop.f32.mrb[6].mxu1  ;;  %v1187_v10 = vpop.f32.mrb[7].mxu0  ;;  %v1577_v6 = vpack.c.bf16 %v898_v61, %v897_v60 }
 0x253   :  { %v633_v11 = vadd.f32 %v1223_v0, %v558_v4  ;;  %v1188_v12 = vadd.f32 %v1187_v10, %v1186_v5  ;;  %v1225_v13 = vpop.f32.mrb[7].mxu1  ;;  %v929_v0 = vld [vmem:[#allocation10 + $0x140] sm:$0xff]  ;;  %v947_v4 = vld [vmem:[#allocation10 + $0x1d0] sm:$0xff]  ;;  %v948_v5 = vld [vmem:[#allocation10 + $0x1d8] sm:$0xff]  ;;  %v1579_v10 = vpack.c.bf16 %v916_v3, %v915_v2 }
 0x254   :  { %v1226_v18 = vadd.f32 %v1225_v13, %v1224_v9  ;;  %v1609_v7 = vpack.c.bf16 %v930_v1, %v929_v0  ;;  %v900_v9 = vld [vmem:[#allocation10 + $0x58] sm:$0xff] }
 0x255   :  { %1110 = vst [vmem:[#allocation11] sm:$0xff] %v633_v11  ;;  %v563_v24 = vadd.f32 %v1188_v12, %v1149_v58  ;;  %792 = vmatmul.mubr.f32.vlgmr.msra.gmra.mrb[8].mxu0 %v633_v11  ;;  %869 = vmatmul.mubr.f32.vlgmr.msra.gmra.mrb[8].mxu1 %v633_v11  ;;  %v1611_v11 = vpack.c.bf16 %v948_v5, %v947_v4  ;;  %v931_v12 = vld [vmem:[#allocation10 + $0x150] sm:$0xff]  ;;  %v932_v13 = vld [vmem:[#allocation10 + $0x158] sm:$0xff] }
 0x256   :  { %797 = vmatprep.mubr.f32.mxu0 %v1812_v49  ;;  %874 = vmatprep.mubr.f32.mxu1 %v1812_v49  ;;  %v896_v49 = vld [vmem:[#allocation10 + $0x38] sm:$0xff] }
 0x257   :  { %v638_v28 = vadd.f32 %v1226_v18, %v563_v24  ;;  %1562 = vmatpush3.bf16.msra.mxu0 %v1561_v14  ;;  %1594 = vmatpush3.bf16.msra.mxu1 %v1593_v15  ;;  %v1573_v58 = vpack.c.bf16 %v896_v49, %v895_v45  ;;  %v917_v14 = vld [vmem:[#allocation10 + $0xe0] sm:$0xff]  ;;  %v918_v15 = vld [vmem:[#allocation10 + $0xe8] sm:$0xff]  ;;  %v1581_v18 = vpack.c.bf16 %v900_v9, %v899_v8 }
 0x258   :  { %1564 = vmatprep.subr.bf16.mxu0 %v1563_v19  ;;  %1596 = vmatprep.subr.bf16.mxu1 %v1595_v20  ;;  %v1613_v19 = vpack.c.bf16 %v932_v13, %v931_v12  ;;  %v1583_v20 = vpack.c.bf16 %v918_v15, %v917_v14  ;;  %v933_v24 = vld [vmem:[#allocation10 + $0x160] sm:$0xff]  ;;  %v714_v45 = vrot.slane %v705_v40, %v244_v47 }
 0x259   :  { %1111 = vst [vmem:[#allocation11 + $0x8] sm:$0xff] %v638_v28  ;;  %798 = vmatmul.mubr.f32.gmra.mrb[10].mxu0 %v638_v28  ;;  %875 = vmatmul.mubr.f32.gmra.mrb[10].mxu1 %v638_v28  ;;  %v1617_v27 = vpack.c.bf16 %v934_v26, %v933_v24  ;;  %v919_v28 = vld [vmem:[#allocation10 + $0xf0] sm:$0xff]  ;;  %v722_v49 = vrot.slane %v705_v40, %v252_v48 }
 0x25b   :  { %1566 = vmatpush3.bf16.msra.mxu0 %v1565_v29  ;;  %1598 = vmatpush3.bf16.msra.mxu1 %v1597_v30  ;;  %v920_v29 = vld [vmem:[#allocation10 + $0xf8] sm:$0xff]  ;;  %v951_v30 = vld [vmem:[#allocation10 + $0x1f0] sm:$0xff] }
 0x25c   :  { %1568 = vmatprep.subr.bf16.mxu0 %v1567_v33  ;;  %1600 = vmatprep.subr.bf16.mxu1 %v1599_v34  ;;  %v1587_v31 = vpack.c.bf16 %v920_v29, %v919_v28  ;;  %v903_v33 = vld [vmem:[#allocation10 + $0x70] sm:$0xff]  ;;  %v904_v34 = vld [vmem:[#allocation10 + $0x78] sm:$0xff]  ;;  %v1619_v35 = vpack.c.bf16 %v952_v32, %v951_v30 }
 0x25d   :  { %v1589_v36 = vpack.c.bf16 %v904_v34, %v903_v33 }
 0x25f   :  { %1570 = vmatpush3.bf16.msra.mxu0 %v1569_v41  ;;  %1602 = vmatpush3.bf16.msra.mxu1 %v1601_v42  ;;  %v710_v41 = vrot.slane %v705_v40, %v240_v44  ;;  %v718_v42 = vrot.slane %v705_v40, %v248_v46 }
 0x260   :  { %1572 = vmatprep.subr.bf16.mxu0 %v1571_v50  ;;  %1604 = vmatprep.subr.bf16.mxu1 %v1603_v51 }
 0x263   :  { %1574 = vmatpush3.bf16.msra.mxu0 %v1573_v58  ;;  %1606 = vmatpush3.bf16.msra.mxu1 %v1605_v59 }
 0x264   :  { %1576 = vmatprep.subr.bf16.mxu0 %v1575_v62  ;;  %1608 = vmatprep.subr.bf16.mxu1 %v1607_v63 }
 0x267   :  { %1578 = vmatpush3.bf16.msra.mxu0 %v1577_v6  ;;  %1610 = vmatpush3.bf16.msra.mxu1 %v1609_v7 }
 0x268   :  { %1580 = vmatprep.subr.bf16.mxu0 %v1579_v10  ;;  %1612 = vmatprep.subr.bf16.mxu1 %v1611_v11 }
 0x26b   :  { %1582 = vmatpush3.bf16.msra.mxu0 %v1581_v18  ;;  %1614 = vmatpush3.bf16.msra.mxu1 %v1613_v19 }
 0x26c   :  { %1584 = vmatprep.subr.bf16.mxu0 %v1583_v20  ;;  %1616 = vmatprep.subr.bf16.mxu1 %v1615_v21 }
 0x26f   :  { %1586 = vmatpush3.bf16.msra.mxu0 %v1585_v25  ;;  %1618 = vmatpush3.bf16.msra.mxu1 %v1617_v27 }
 0x270   :  { %1588 = vmatprep.subr.bf16.mxu0 %v1587_v31  ;;  %1620 = vmatprep.subr.bf16.mxu1 %v1619_v35 }
 0x273   :  { %1590 = vmatpush3.bf16.msra.mxu0 %v1589_v36  ;;  %1622 = vmatpush3.bf16.msra.mxu1 %v1621_v39 }
 0x328   :  { %v793_v50 = vpop.f32.mrb[8].mxu0  ;;  %v870_v51 = vpop.f32.mrb[8].mxu1 }
 0x329   :  { %v794_v52 = vadd.f32 %v793_v50, %v710_v41  ;;  %v871_v53 = vadd.f32 %v870_v51, %v718_v42  ;;  %v795_v54 = vpop.f32.mrb[9].mxu0  ;;  %v872_v55 = vpop.f32.mrb[9].mxu1 }
 0x32a   :  { %v796_v56 = vadd.f32 %v795_v54, %v714_v45  ;;  %v873_v57 = vadd.f32 %v872_v55, %v722_v49 }
 0x32b   :  { %v881_v61 = vmax.f32 %v794_v52, 0.0  ;;  %v883_v46 = vmax.f32 %v871_v53, 0.0 }
 0x32c   :  { %v882_v58 = vmax.f32 %v796_v56, 0.0  ;;  %v884_v59 = vmax.f32 %v873_v57, 0.0  ;;  %v799_v44 = vpop.f32.mrb[10].mxu0  ;;  %v876_v60 = vpop.f32.mrb[10].mxu1 }
 0x32d   :  { %v800_v62 = vadd.f32 %v799_v44, %v710_v41  ;;  %v877_v63 = vadd.f32 %v876_v60, %v718_v42  ;;  %v801_v47 = vpop.f32.mrb[11].mxu0  ;;  %v878_v0 = vpop.f32.mrb[11].mxu1 }
 0x32e   :  { %v802_v43 = vadd.f32 %v801_v47, %v714_v45  ;;  %v879_v48 = vadd.f32 %v878_v0, %v722_v49  ;;  %1024 = vmatprep.mubr.f32.mxu0 %v882_v58  ;;  %1099 = vmatprep.mubr.f32.mxu1 %v884_v59 }
 0x32f   :  { %1025 = vmatmul.mubr.f32.vlgmr.msra.gmra.mrb[12].mxu0 %v881_v61  ;;  %1100 = vmatmul.mubr.f32.vlgmr.msra.gmra.mrb[12].mxu1 %v883_v46  ;;  %v885_v3 = vmax.f32 %v800_v62, 0.0  ;;  %v887_v4 = vmax.f32 %v877_v63, 0.0 }
 0x330   :  { %v886_v1 = vmax.f32 %v802_v43, 0.0  ;;  %v888_v2 = vmax.f32 %v879_v48, 0.0 }
 0x332   :  { %1029 = vmatprep.mubr.f32.mxu0 %v886_v1  ;;  %1104 = vmatprep.mubr.f32.mxu1 %v888_v2 }
 0x333   :  { %1030 = vmatmul.mubr.f32.gmra.mrb[14].mxu0 %v885_v3  ;;  %1105 = vmatmul.mubr.f32.gmra.mrb[14].mxu1 %v887_v4 }
 0x334   :  { %1758 = shalt.err (!%p1755_p2)
}
 0x335   :  { %s1759_s20 = scalar_lea.hbm %s2009_s9, 256 }
 0x336   :  { %p1760_p3 = scmp.ne.s32.totalorder %s2009_s9, %s1759_s20  ;;  %p1763_p4 = scmp.lt.u32.totalorder %s1759_s20, %s2009_s9 }
 0x338   :  { %p1765_p5 = pnand %p1763_p4, %p1760_p3 }
 0x33a   :  { %1768 = shalt.err (!%p1765_p5)
}
 0x33b   :  { %1125 = dma.vmem_to_hbm [thread:$0]  %s1120_s18, 256, %s2009_s9, [#allocation4], %s1809_s0, %s1809_s0, %s1810_s30  }
 0x33c   :  { %v1150_v7 = vld [vmem:[%s2008_s8] ss:$0 sm:$0xff]  ;;  %s1814_s23 = smov [#allocation12]  }
 0x33d   :  { %s1131_s9 = sshll.u32 %s1814_s23, 4  ;;  %s1132_s9 = int_to_ptr.vmem [resolvable:$true] %s1131_s9 }
 0x33e   :  { %s1769_s8 = scalar_lea.vmem %s1132_s9, 256  ;;  %p1774_p7 = scmp.lt.s32.totalorder %s1132_s9, %s1132_s9 }
 0x33f   :  { %p1770_p6 = scmp.ne.s32.totalorder %s1132_s9, %s1769_s8  ;;  %p1775_p8 = scmp.lt.s32.totalorder %s1769_s8, %s1769_s8 }
 0x341   :  { %p1776_p9 = por %p1775_p8, %p1774_p7 }
 0x343   :  { %p1777_p10 = pnand %p1776_p9, %p1770_p6 }
 0x402   :  { %v1259_v5 = vpop.f32.mrb[12].mxu0  ;;  %v1297_v6 = vpop.f32.mrb[12].mxu1 }
 0x403   :  { %v1260_v8 = vpop.f32.mrb[13].mxu0  ;;  %v1298_v9 = vpop.f32.mrb[13].mxu1 }
 0x404   :  { %v1261_v10 = vadd.f32 %v1260_v8, %v1259_v5  ;;  %v1299_v11 = vadd.f32 %v1298_v9, %v1297_v6 }
 0x406   :  { %v1027_v12 = vadd.f32 %v1261_v10, %v1150_v7  ;;  %v1262_v13 = vpop.f32.mrb[14].mxu0  ;;  %v1300_v14 = vpop.f32.mrb[14].mxu1 }
 0x407   :  { %v1263_v15 = vpop.f32.mrb[15].mxu0  ;;  %v1301_v16 = vpop.f32.mrb[15].mxu1 }
 0x408   :  { %v1102_v17 = vadd.f32 %v1299_v11, %v1027_v12  ;;  %v1264_v18 = vadd.f32 %v1263_v15, %v1262_v13  ;;  %v1302_v19 = vadd.f32 %v1301_v16, %v1300_v14 }
 0x40a   :  { %1112 = vst [vmem:[#allocation12] sm:$0xff] %v1102_v17  ;;  %v1032_v20 = vadd.f32 %v1264_v18, %v1150_v7 }
 0x40c   :  { %v1107_v21 = vadd.f32 %v1302_v19, %v1032_v20 }
 0x40e   :  { %1113 = vst [vmem:[#allocation12 + $0x8] sm:$0xff] %v1107_v21 }
 0x40f   :  { %1780 = shalt.err (!%p1777_p10)
}
 0x410   :  { %s1781_s12 = scalar_lea.hbm %s2010_s10, 256 }
 0x411   :  { %p1782_p11 = scmp.ne.s32.totalorder %s2010_s10, %s1781_s12  ;;  %p1785_p12 = scmp.lt.u32.totalorder %s1781_s12, %s2010_s10 }
 0x413   :  { %p1787_p13 = pnand %p1785_p12, %p1782_p11 }
 0x415   :  { %1790 = shalt.err (!%p1787_p13)
}
 0x416   :  { %1137 = dma.vmem_to_hbm [thread:$0]  %s1132_s9, 256, %s2010_s10, [#allocation13], %s1809_s0, %s1809_s0, %s1810_s30  }
 0x417   :  { %1797 = dma.done.wait [#allocation4], 256  }
 0x418   :  { %1798 = vsyncadd [#allocation4], 4294967040 }
 0x419   :  { %1799 = dma.done.wait [#allocation13], 256  }
 0x41a   :  { %1800 = vsyncadd [#allocation13], 4294967040 }
 0x41b   :  { %1144 = vsyncpa [#allocation3], 1 }
 0x41c   :  { %1145 = vsyncpa [#allocation6], 1 }
 0x41d   :  { %1146 = vsyncpa [#allocation9], 1 }
 0x41e   :  { %1147 = vsyncpa [#allocation4], 1 }
 0x41f   :  { %1148 = vsyncpa [#allocation13], 1 }

</bundles_post_ra>
